<compile_context>
chip_gen: v7x
topology: tpu7x:2x2x1
jax: 0.10.0
libtpu: 0.0.40
codegen_flags: <defaults>
</compile_context>

<pallas_src>
import jax
import jax.numpy as jnp
from jax import lax
from jax.experimental import pallas as pl
from jax.experimental.pallas import tpu as pltpu

N_USERS = 500
N_ITEMS = 300
N_FACTORS = 10
DEEP_LAYERS = [20, 10]

LANE = 128
CHUNK = 128                                        # contraction chunk (table rows)
DEFAULT_TILE_B = 2048                              # batch tile; sweep 1024-4096

N_COMBINED = N_USERS + N_ITEMS                     # 800
K_PAD = (N_COMBINED + CHUNK - 1) // CHUNK * CHUNK  # 896
N_CHUNKS = K_PAD // CHUNK                          # 7
N_H1 = DEEP_LAYERS[0]                              # 20
N_H2 = DEEP_LAYERS[1]                              # 10
ROWS = N_H1 + 1                                    # 20 hidden pre-acts + 1 wide row


def _round_up(x, m):
    return (x + m - 1) // m * m


def _choose_tiling(B, tile_b):
    """Lane-dense batch tile + an even (>=2) tile count when the batch allows,
    so v7x's two TensorCores both get work.  Tiny batches use a single tile."""
    tile_b = max(LANE, _round_up(tile_b, LANE))
    if B <= LANE:
        return LANE, 1
    nt = max(2, -(-B // tile_b))
    if nt % 2:
        nt += 1
    tile = _round_up(-(-B // nt), LANE)
    return tile, nt


# ----------------------------------------------------------------------------
# Pallas kernel: one batch tile of the full Wide & Deep forward pass
# ----------------------------------------------------------------------------
def wide_deep_kernel(idx_ref,      # (2, T) int32: row0 = user idx, row1 = item idx + N_USERS
                     table_ref,    # (N_CHUNKS, ROWS, CHUNK) f32 folded table (resident)
                     b1_ref,       # (N_H1, 1) f32
                     w2_ref,       # (N_H2, N_H1) f32
                     b2_ref,       # (N_H2, 1) f32
                     wo_ref,       # (1, N_H2) f32
                     bo_ref,       # SMEM (1,) f32
                     out_ref):     # (1, T) f32
    tile = out_ref.shape[-1]
    u_idx = idx_ref[0:1, :]                        # (1, T)
    i_idx = idx_ref[1:2, :]                        # (1, T), already offset by N_USERS

    # Chunked two-hot contraction against the folded (ROWS, U+I) table:
    # only a (CHUNK, T) slice of the selection matrix is ever live.
    def body(c, acc):
        base = c * CHUNK
        rid = lax.broadcasted_iota(jnp.int32, (CHUNK, 1), 0) + base     # (CHUNK, 1)
        two_hot = jnp.logical_or(rid == u_idx, rid == i_idx).astype(jnp.float32)
        return acc + jnp.dot(table_ref[c], two_hot,
                             preferred_element_type=jnp.float32)        # (ROWS, T)

    acc = lax.fori_loop(0, N_CHUNKS, body,
                        jnp.zeros((ROWS, tile), jnp.float32), unroll=True)

    # TODO(synk): nn.Dropout(0.1) layers are treated as identity (inference mode).
    h = jnp.maximum(acc[0:N_H1, :] + b1_ref[...], 0.0)                  # (20, T)
    wide = acc[N_H1:N_H1 + 1, :]                                        # (1, T), already wo-scaled

    h = jnp.maximum(jnp.dot(w2_ref[...], h,
                            preferred_element_type=jnp.float32) + b2_ref[...], 0.0)  # (10, T)

    out_ref[...] = (jnp.dot(wo_ref[...], h, preferred_element_type=jnp.float32)
                    + wide + bo_ref[0])                                 # (1, T)


# ----------------------------------------------------------------------------
# Wrapper
# ----------------------------------------------------------------------------
def wide_deep_forward(params, user_idx, item_idx, *, tile_b=DEFAULT_TILE_B):
    """Fused Wide & Deep forward. Returns shape (B,) like torch's .squeeze()."""
    kp = prepare_kernel_params(params)
    B = int(user_idx.shape[0])

    tile, num_tiles = _choose_tiling(B, tile_b)
    b_pad = tile * num_tiles
    pad = b_pad - B

    # Pack both index streams into a single (num_tiles, 2, tile) int32 array.
    u = jnp.pad(user_idx.astype(jnp.int32), (0, pad))
    it = jnp.pad(item_idx.astype(jnp.int32), (0, pad)) + N_USERS
    idx = jnp.stack([u, it], axis=0).reshape(2, num_tiles, tile).transpose(1, 0, 2)

    vmem_full = pl.BlockSpec(memory_space=pltpu.MemorySpace.VMEM)
    smem_full = pl.BlockSpec(memory_space=pltpu.MemorySpace.SMEM)

    out = pl.pallas_call(
        wide_deep_kernel,
        out_shape=jax.ShapeDtypeStruct((num_tiles, 1, tile), jnp.float32),
        grid=(num_tiles,),
        in_specs=[
            pl.BlockSpec((None, 2, tile), lambda i: (i, 0, 0)),   # packed indices
            vmem_full,                                            # folded table (resident)
            vmem_full, vmem_full, vmem_full, vmem_full,           # b1, w2, b2, wo_deep
            smem_full,                                            # bo scalar
        ],
        out_specs=pl.BlockSpec((None, 1, tile), lambda i: (i, 0, 0)),
        compiler_params=pltpu.CompilerParams(
            dimension_semantics=("parallel",)),
    )(idx, kp["table"], kp["b1"], kp["w2"], kp["b2"], kp["wo_deep"], kp["bo"])

    return out.reshape(-1)[:B]


# ----------------------------------------------------------------------------
# Parameters (torch-equivalent logical layout) + folded kernel layout
# ----------------------------------------------------------------------------
def init_params(key):
    """Mirrors the torch module's _init_weights (xavier Linear, N(0,0.01) emb)."""
    ks = jax.random.split(key, 7)

    def xavier(k, out_f, in_f):
        bound = (6.0 / (in_f + out_f)) ** 0.5
        return jax.random.uniform(k, (out_f, in_f), jnp.float32,
                                  minval=-bound, maxval=bound)

    return {
        "wide_user_emb": 0.01 * jax.random.normal(ks[0], (N_USERS, 1), jnp.float32),
        "wide_item_emb": 0.01 * jax.random.normal(ks[1], (N_ITEMS, 1), jnp.float32),
        "deep_user_emb": 0.01 * jax.random.normal(ks[2], (N_USERS, N_FACTORS), jnp.float32),
        "deep_item_emb": 0.01 * jax.random.normal(ks[3], (N_ITEMS, N_FACTORS), jnp.float32),
        "w1": xavier(ks[4], DEEP_LAYERS[0], 2 * N_FACTORS),   # (20, 20) (out, in)
        "b1": jnp.zeros((DEEP_LAYERS[0],), jnp.float32),
        "w2": xavier(ks[5], DEEP_LAYERS[1], DEEP_LAYERS[0]),  # (10, 20)
        "b2": jnp.zeros((DEEP_LAYERS[1],), jnp.float32),
        "wo": xavier(ks[6], 1, DEEP_LAYERS[-1] + 2),          # (1, 12)
        "bo": jnp.zeros((1,), jnp.float32),
    }


def prepare_kernel_params(p):
    """Fold layer-1 weights + output wide scalars into one (ROWS, U+I) table,
    chunked along the contraction dim as (N_CHUNKS, ROWS, CHUNK)."""
    hi = jax.lax.Precision.HIGHEST
    F = N_FACTORS
    w1u, w1i = p["w1"][:, :F], p["w1"][:, F:]

    fold_u = jnp.concatenate(
        [jnp.dot(w1u, p["deep_user_emb"].T, precision=hi),     # (20, U)
         p["wo"][0, 0] * p["wide_user_emb"].T], axis=0)        # (1, U)
    fold_i = jnp.concatenate(
        [jnp.dot(w1i, p["deep_item_emb"].T, precision=hi),     # (20, I)
         p["wo"][0, 1] * p["wide_item_emb"].T], axis=0)        # (1, I)

    table = jnp.concatenate([fold_u, fold_i], axis=1)                    # (21, 800)
    table = jnp.pad(table, ((0, 0), (0, K_PAD - N_COMBINED)))            # (21, 896)
    table = table.reshape(ROWS, N_CHUNKS, CHUNK).transpose(1, 0, 2)      # (7, 21, 128)

    return {
        "table": table,
        "b1": p["b1"][:, None],          # (20, 1)
        "w2": p["w2"],                   # (10, 20)
        "b2": p["b2"][:, None],          # (10, 1)
        "wo_deep": p["wo"][:, 2:],       # (1, 10)
        "bo": p["bo"],                   # (1,) -> SMEM scalar
    }


# ----------------------------------------------------------------------------
# Pure-JAX reference (standard row-major layout) for sanity checking
# ----------------------------------------------------------------------------
def reference_forward(p, user_idx, item_idx):
    hi = jax.lax.Precision.HIGHEST
    wide = jnp.concatenate([p["wide_user_emb"][user_idx],
                            p["wide_item_emb"][item_idx]], axis=1)        # (B, 2)
    deep = jnp.concatenate([p["deep_user_emb"][user_idx],
                            p["deep_item_emb"][item_idx]], axis=1)        # (B, 2F)
    h = jnp.maximum(jnp.dot(deep, p["w1"].T, precision=hi) + p["b1"], 0.0)
    h = jnp.maximum(jnp.dot(h, p["w2"].T, precision=hi) + p["b2"], 0.0)
    comb = jnp.concatenate([wide, h], axis=1)                             # (B, 12)
    return (jnp.dot(comb, p["wo"].T, precision=hi) + p["bo"]).reshape(-1)


if __name__ == "__main__":
    key = jax.random.PRNGKey(0)
    pkey, ukey, ikey, ukey2, ikey2 = jax.random.split(key, 5)
    params = init_params(pkey)

    # Small demo batch (single tile).
    B = 8
    user_idx = jax.random.randint(ukey, (B,), 0, N_USERS, dtype=jnp.int32)
    item_idx = jax.random.randint(ikey, (B,), 0, N_ITEMS, dtype=jnp.int32)

    out = jax.block_until_ready(wide_deep_forward(params, user_idx, item_idx))
    ref = reference_forward(params, user_idx, item_idx)
    assert out.shape == (B,)
    assert jnp.allclose(out, ref, atol=1e-4, rtol=1e-4)

    # Multi-tile path (exercises the even-tile batch grid + tail padding).
    B2 = 1300
    user_idx2 = jax.random.randint(ukey2, (B2,), 0, N_USERS, dtype=jnp.int32)
    item_idx2 = jax.random.randint(ikey2, (B2,), 0, N_ITEMS, dtype=jnp.int32)
    out2 = jax.block_until_ready(wide_deep_forward(params, user_idx2, item_idx2))
    ref2 = reference_forward(params, user_idx2, item_idx2)
    assert out2.shape == (B2,)
    assert jnp.allclose(out2, ref2, atol=1e-4, rtol=1e-4)

    print("KERNEL_OK")
</pallas_src>

<mosaic_0001>
module attributes {stable_mosaic.version = 11 : i64} {
  func.func @wide_deep_kernel(%arg0: i32, %arg1: memref<1x2x128xi32, #tpu.memory_space<vmem>>, %arg2: memref<7x21x128xf32, #tpu.memory_space<vmem>>, %arg3: memref<20x1xf32, #tpu.memory_space<vmem>>, %arg4: memref<10x20xf32, #tpu.memory_space<vmem>>, %arg5: memref<10x1xf32, #tpu.memory_space<vmem>>, %arg6: memref<1x10xf32, #tpu.memory_space<vmem>>, %arg7: memref<1xf32, #tpu.memory_space<smem>>, %arg8: memref<1x1x128xf32, #tpu.memory_space<vmem>>) attributes {dimension_semantics = [#tpu.dimension_semantics<parallel>], iteration_bounds = array<i64: 1>, scalar_prefetch = 0 : i64, scratch_operands = 0 : i64, tpu.core_type = #tpu.core_type<tc>, window_params = [{transform_indices = @transform_0, window_bounds = array<i64: 1, 2, 128>}, {pipeline_mode = #tpu.pipeline_mode<synchronous>, transform_indices = @transform_1, window_bounds = array<i64: 7, 21, 128>}, {pipeline_mode = #tpu.pipeline_mode<synchronous>, transform_indices = @transform_2, window_bounds = array<i64: 20, 1>}, {pipeline_mode = #tpu.pipeline_mode<synchronous>, transform_indices = @transform_3, window_bounds = array<i64: 10, 20>}, {pipeline_mode = #tpu.pipeline_mode<synchronous>, transform_indices = @transform_4, window_bounds = array<i64: 10, 1>}, {pipeline_mode = #tpu.pipeline_mode<synchronous>, transform_indices = @transform_5, window_bounds = array<i64: 1, 10>}, {transform_indices = @transform_6, window_bounds = array<i64: 1>}, {transform_indices = @transform_7, window_bounds = array<i64: 1, 1, 128>}]} {
    %c0 = arith.constant 0 : index
    %c0_0 = arith.constant 0 : index
    %c0_1 = arith.constant 0 : index
    %0 = vector.load %arg1[%c0, %c0_0, %c0_1] : memref<1x2x128xi32, #tpu.memory_space<vmem>>, vector<1x1x128xi32>
    %1 = vector.shape_cast %0 : vector<1x1x128xi32> to vector<1x128xi32>
    %c0_2 = arith.constant 0 : index
    %c1 = arith.constant 1 : index
    %c0_3 = arith.constant 0 : index
    %2 = vector.load %arg1[%c0_2, %c1, %c0_3] : memref<1x2x128xi32, #tpu.memory_space<vmem>>, vector<1x1x128xi32>
    %3 = vector.shape_cast %2 : vector<1x1x128xi32> to vector<1x128xi32>
    %cst = arith.constant 0.000000e+00 : f32
    %4 = vector.broadcast %cst : f32 to vector<21x128xf32>
    %c0_i32 = arith.constant 0 : i32
    %c128_i32 = arith.constant 128 : i32
    %5 = arith.muli %c0_i32, %c128_i32 : i32
    %6 = tpu.iota {dimensions = array<i32: 0>} : vector<128x1xi32>
    %7 = vector.broadcast %5 : i32 to vector<128x1xi32>
    %8 = arith.addi %6, %7 : vector<128x1xi32>
    %9 = vector.broadcast %8 : vector<128x1xi32> to vector<128x128xi32>
    %10 = vector.broadcast %1 : vector<1x128xi32> to vector<128x128xi32>
    %11 = arith.cmpi eq, %9, %10 : vector<128x128xi32>
    %12 = vector.broadcast %8 : vector<128x1xi32> to vector<128x128xi32>
    %13 = vector.broadcast %3 : vector<1x128xi32> to vector<128x128xi32>
    %14 = arith.cmpi eq, %12, %13 : vector<128x128xi32>
    %15 = arith.ori %11, %14 : vector<128x128xi1>
    %16 = arith.extui %15 : vector<128x128xi1> to vector<128x128xi32>
    %17 = arith.sitofp %16 : vector<128x128xi32> to vector<128x128xf32>
    %18 = arith.index_cast %c0_i32 : i32 to index
    %c0_4 = arith.constant 0 : index
    %c0_5 = arith.constant 0 : index
    %19 = vector.load %arg2[%18, %c0_4, %c0_5] : memref<7x21x128xf32, #tpu.memory_space<vmem>>, vector<1x21x128xf32>
    %20 = vector.shape_cast %19 : vector<1x21x128xf32> to vector<21x128xf32>
    %cst_6 = arith.constant dense<0.000000e+00> : vector<21x128xf32>
    %21 = tpu.matmul %20, %17, %cst_6 {dimension_numbers = #tpu.dot_dimension_numbers<[1], [0], [0], [1], [0, 0, 1, 1], [], []>} : vector<21x128xf32>, vector<128x128xf32>, vector<21x128xf32> -> vector<21x128xf32>
    %22 = arith.addf %4, %21 : vector<21x128xf32>
    %c1_i32 = arith.constant 1 : i32
    %c128_i32_7 = arith.constant 128 : i32
    %23 = arith.muli %c1_i32, %c128_i32_7 : i32
    %24 = tpu.iota {dimensions = array<i32: 0>} : vector<128x1xi32>
    %25 = vector.broadcast %23 : i32 to vector<128x1xi32>
    %26 = arith.addi %24, %25 : vector<128x1xi32>
    %27 = vector.broadcast %26 : vector<128x1xi32> to vector<128x128xi32>
    %28 = vector.broadcast %1 : vector<1x128xi32> to vector<128x128xi32>
    %29 = arith.cmpi eq, %27, %28 : vector<128x128xi32>
    %30 = vector.broadcast %26 : vector<128x1xi32> to vector<128x128xi32>
    %31 = vector.broadcast %3 : vector<1x128xi32> to vector<128x128xi32>
    %32 = arith.cmpi eq, %30, %31 : vector<128x128xi32>
    %33 = arith.ori %29, %32 : vector<128x128xi1>
    %34 = arith.extui %33 : vector<128x128xi1> to vector<128x128xi32>
    %35 = arith.sitofp %34 : vector<128x128xi32> to vector<128x128xf32>
    %36 = arith.index_cast %c1_i32 : i32 to index
    %c0_8 = arith.constant 0 : index
    %c0_9 = arith.constant 0 : index
    %37 = vector.load %arg2[%36, %c0_8, %c0_9] : memref<7x21x128xf32, #tpu.memory_space<vmem>>, vector<1x21x128xf32>
    %38 = vector.shape_cast %37 : vector<1x21x128xf32> to vector<21x128xf32>
    %cst_10 = arith.constant dense<0.000000e+00> : vector<21x128xf32>
    %39 = tpu.matmul %38, %35, %cst_10 {dimension_numbers = #tpu.dot_dimension_numbers<[1], [0], [0], [1], [0, 0, 1, 1], [], []>} : vector<21x128xf32>, vector<128x128xf32>, vector<21x128xf32> -> vector<21x128xf32>
    %40 = arith.addf %22, %39 : vector<21x128xf32>
    %c2_i32 = arith.constant 2 : i32
    %c128_i32_11 = arith.constant 128 : i32
    %41 = arith.muli %c2_i32, %c128_i32_11 : i32
    %42 = tpu.iota {dimensions = array<i32: 0>} : vector<128x1xi32>
    %43 = vector.broadcast %41 : i32 to vector<128x1xi32>
    %44 = arith.addi %42, %43 : vector<128x1xi32>
    %45 = vector.broadcast %44 : vector<128x1xi32> to vector<128x128xi32>
    %46 = vector.broadcast %1 : vector<1x128xi32> to vector<128x128xi32>
    %47 = arith.cmpi eq, %45, %46 : vector<128x128xi32>
    %48 = vector.broadcast %44 : vector<128x1xi32> to vector<128x128xi32>
    %49 = vector.broadcast %3 : vector<1x128xi32> to vector<128x128xi32>
    %50 = arith.cmpi eq, %48, %49 : vector<128x128xi32>
    %51 = arith.ori %47, %50 : vector<128x128xi1>
    %52 = arith.extui %51 : vector<128x128xi1> to vector<128x128xi32>
    %53 = arith.sitofp %52 : vector<128x128xi32> to vector<128x128xf32>
    %54 = arith.index_cast %c2_i32 : i32 to index
    %c0_12 = arith.constant 0 : index
    %c0_13 = arith.constant 0 : index
    %55 = vector.load %arg2[%54, %c0_12, %c0_13] : memref<7x21x128xf32, #tpu.memory_space<vmem>>, vector<1x21x128xf32>
    %56 = vector.shape_cast %55 : vector<1x21x128xf32> to vector<21x128xf32>
    %cst_14 = arith.constant dense<0.000000e+00> : vector<21x128xf32>
    %57 = tpu.matmul %56, %53, %cst_14 {dimension_numbers = #tpu.dot_dimension_numbers<[1], [0], [0], [1], [0, 0, 1, 1], [], []>} : vector<21x128xf32>, vector<128x128xf32>, vector<21x128xf32> -> vector<21x128xf32>
    %58 = arith.addf %40, %57 : vector<21x128xf32>
    %c3_i32 = arith.constant 3 : i32
    %c128_i32_15 = arith.constant 128 : i32
    %59 = arith.muli %c3_i32, %c128_i32_15 : i32
    %60 = tpu.iota {dimensions = array<i32: 0>} : vector<128x1xi32>
    %61 = vector.broadcast %59 : i32 to vector<128x1xi32>
    %62 = arith.addi %60, %61 : vector<128x1xi32>
    %63 = vector.broadcast %62 : vector<128x1xi32> to vector<128x128xi32>
    %64 = vector.broadcast %1 : vector<1x128xi32> to vector<128x128xi32>
    %65 = arith.cmpi eq, %63, %64 : vector<128x128xi32>
    %66 = vector.broadcast %62 : vector<128x1xi32> to vector<128x128xi32>
    %67 = vector.broadcast %3 : vector<1x128xi32> to vector<128x128xi32>
    %68 = arith.cmpi eq, %66, %67 : vector<128x128xi32>
    %69 = arith.ori %65, %68 : vector<128x128xi1>
    %70 = arith.extui %69 : vector<128x128xi1> to vector<128x128xi32>
    %71 = arith.sitofp %70 : vector<128x128xi32> to vector<128x128xf32>
    %72 = arith.index_cast %c3_i32 : i32 to index
    %c0_16 = arith.constant 0 : index
    %c0_17 = arith.constant 0 : index
    %73 = vector.load %arg2[%72, %c0_16, %c0_17] : memref<7x21x128xf32, #tpu.memory_space<vmem>>, vector<1x21x128xf32>
    %74 = vector.shape_cast %73 : vector<1x21x128xf32> to vector<21x128xf32>
    %cst_18 = arith.constant dense<0.000000e+00> : vector<21x128xf32>
    %75 = tpu.matmul %74, %71, %cst_18 {dimension_numbers = #tpu.dot_dimension_numbers<[1], [0], [0], [1], [0, 0, 1, 1], [], []>} : vector<21x128xf32>, vector<128x128xf32>, vector<21x128xf32> -> vector<21x128xf32>
    %76 = arith.addf %58, %75 : vector<21x128xf32>
    %c4_i32 = arith.constant 4 : i32
    %c128_i32_19 = arith.constant 128 : i32
    %77 = arith.muli %c4_i32, %c128_i32_19 : i32
    %78 = tpu.iota {dimensions = array<i32: 0>} : vector<128x1xi32>
    %79 = vector.broadcast %77 : i32 to vector<128x1xi32>
    %80 = arith.addi %78, %79 : vector<128x1xi32>
    %81 = vector.broadcast %80 : vector<128x1xi32> to vector<128x128xi32>
    %82 = vector.broadcast %1 : vector<1x128xi32> to vector<128x128xi32>
    %83 = arith.cmpi eq, %81, %82 : vector<128x128xi32>
    %84 = vector.broadcast %80 : vector<128x1xi32> to vector<128x128xi32>
    %85 = vector.broadcast %3 : vector<1x128xi32> to vector<128x128xi32>
    %86 = arith.cmpi eq, %84, %85 : vector<128x128xi32>
    %87 = arith.ori %83, %86 : vector<128x128xi1>
    %88 = arith.extui %87 : vector<128x128xi1> to vector<128x128xi32>
    %89 = arith.sitofp %88 : vector<128x128xi32> to vector<128x128xf32>
    %90 = arith.index_cast %c4_i32 : i32 to index
    %c0_20 = arith.constant 0 : index
    %c0_21 = arith.constant 0 : index
    %91 = vector.load %arg2[%90, %c0_20, %c0_21] : memref<7x21x128xf32, #tpu.memory_space<vmem>>, vector<1x21x128xf32>
    %92 = vector.shape_cast %91 : vector<1x21x128xf32> to vector<21x128xf32>
    %cst_22 = arith.constant dense<0.000000e+00> : vector<21x128xf32>
    %93 = tpu.matmul %92, %89, %cst_22 {dimension_numbers = #tpu.dot_dimension_numbers<[1], [0], [0], [1], [0, 0, 1, 1], [], []>} : vector<21x128xf32>, vector<128x128xf32>, vector<21x128xf32> -> vector<21x128xf32>
    %94 = arith.addf %76, %93 : vector<21x128xf32>
    %c5_i32 = arith.constant 5 : i32
    %c128_i32_23 = arith.constant 128 : i32
    %95 = arith.muli %c5_i32, %c128_i32_23 : i32
    %96 = tpu.iota {dimensions = array<i32: 0>} : vector<128x1xi32>
    %97 = vector.broadcast %95 : i32 to vector<128x1xi32>
    %98 = arith.addi %96, %97 : vector<128x1xi32>
    %99 = vector.broadcast %98 : vector<128x1xi32> to vector<128x128xi32>
    %100 = vector.broadcast %1 : vector<1x128xi32> to vector<128x128xi32>
    %101 = arith.cmpi eq, %99, %100 : vector<128x128xi32>
    %102 = vector.broadcast %98 : vector<128x1xi32> to vector<128x128xi32>
    %103 = vector.broadcast %3 : vector<1x128xi32> to vector<128x128xi32>
    %104 = arith.cmpi eq, %102, %103 : vector<128x128xi32>
    %105 = arith.ori %101, %104 : vector<128x128xi1>
    %106 = arith.extui %105 : vector<128x128xi1> to vector<128x128xi32>
    %107 = arith.sitofp %106 : vector<128x128xi32> to vector<128x128xf32>
    %108 = arith.index_cast %c5_i32 : i32 to index
    %c0_24 = arith.constant 0 : index
    %c0_25 = arith.constant 0 : index
    %109 = vector.load %arg2[%108, %c0_24, %c0_25] : memref<7x21x128xf32, #tpu.memory_space<vmem>>, vector<1x21x128xf32>
    %110 = vector.shape_cast %109 : vector<1x21x128xf32> to vector<21x128xf32>
    %cst_26 = arith.constant dense<0.000000e+00> : vector<21x128xf32>
    %111 = tpu.matmul %110, %107, %cst_26 {dimension_numbers = #tpu.dot_dimension_numbers<[1], [0], [0], [1], [0, 0, 1, 1], [], []>} : vector<21x128xf32>, vector<128x128xf32>, vector<21x128xf32> -> vector<21x128xf32>
    %112 = arith.addf %94, %111 : vector<21x128xf32>
    %c6_i32 = arith.constant 6 : i32
    %c128_i32_27 = arith.constant 128 : i32
    %113 = arith.muli %c6_i32, %c128_i32_27 : i32
    %114 = tpu.iota {dimensions = array<i32: 0>} : vector<128x1xi32>
    %115 = vector.broadcast %113 : i32 to vector<128x1xi32>
    %116 = arith.addi %114, %115 : vector<128x1xi32>
    %117 = vector.broadcast %116 : vector<128x1xi32> to vector<128x128xi32>
    %118 = vector.broadcast %1 : vector<1x128xi32> to vector<128x128xi32>
    %119 = arith.cmpi eq, %117, %118 : vector<128x128xi32>
    %120 = vector.broadcast %116 : vector<128x1xi32> to vector<128x128xi32>
    %121 = vector.broadcast %3 : vector<1x128xi32> to vector<128x128xi32>
    %122 = arith.cmpi eq, %120, %121 : vector<128x128xi32>
    %123 = arith.ori %119, %122 : vector<128x128xi1>
    %124 = arith.extui %123 : vector<128x128xi1> to vector<128x128xi32>
    %125 = arith.sitofp %124 : vector<128x128xi32> to vector<128x128xf32>
    %126 = arith.index_cast %c6_i32 : i32 to index
    %c0_28 = arith.constant 0 : index
    %c0_29 = arith.constant 0 : index
    %127 = vector.load %arg2[%126, %c0_28, %c0_29] : memref<7x21x128xf32, #tpu.memory_space<vmem>>, vector<1x21x128xf32>
    %128 = vector.shape_cast %127 : vector<1x21x128xf32> to vector<21x128xf32>
    %cst_30 = arith.constant dense<0.000000e+00> : vector<21x128xf32>
    %129 = tpu.matmul %128, %125, %cst_30 {dimension_numbers = #tpu.dot_dimension_numbers<[1], [0], [0], [1], [0, 0, 1, 1], [], []>} : vector<21x128xf32>, vector<128x128xf32>, vector<21x128xf32> -> vector<21x128xf32>
    %130 = arith.addf %112, %129 : vector<21x128xf32>
    %c7_i32 = arith.constant 7 : i32
    %131 = vector.extract_strided_slice %130 {offsets = [0, 0], sizes = [20, 128], strides = [1, 1]} : vector<21x128xf32> to vector<20x128xf32>
    %c0_31 = arith.constant 0 : index
    %c0_32 = arith.constant 0 : index
    %132 = vector.load %arg3[%c0_31, %c0_32] : memref<20x1xf32, #tpu.memory_space<vmem>>, vector<20x1xf32>
    %133 = vector.broadcast %132 : vector<20x1xf32> to vector<20x128xf32>
    %134 = arith.addf %131, %133 : vector<20x128xf32>
    %cst_33 = arith.constant 0.000000e+00 : f32
    %135 = vector.broadcast %cst_33 : f32 to vector<20x128xf32>
    %136 = arith.maximumf %134, %135 : vector<20x128xf32>
    %137 = vector.extract_strided_slice %130 {offsets = [20, 0], sizes = [1, 128], strides = [1, 1]} : vector<21x128xf32> to vector<1x128xf32>
    %c0_34 = arith.constant 0 : index
    %c0_35 = arith.constant 0 : index
    %138 = vector.load %arg4[%c0_34, %c0_35] : memref<10x20xf32, #tpu.memory_space<vmem>>, vector<10x20xf32>
    %cst_36 = arith.constant dense<0.000000e+00> : vector<10x128xf32>
    %139 = tpu.matmul %138, %136, %cst_36 {dimension_numbers = #tpu.dot_dimension_numbers<[1], [0], [0], [1], [0, 0, 1, 1], [], []>} : vector<10x20xf32>, vector<20x128xf32>, vector<10x128xf32> -> vector<10x128xf32>
    %c0_37 = arith.constant 0 : index
    %c0_38 = arith.constant 0 : index
    %140 = vector.load %arg5[%c0_37, %c0_38] : memref<10x1xf32, #tpu.memory_space<vmem>>, vector<10x1xf32>
    %141 = vector.broadcast %140 : vector<10x1xf32> to vector<10x128xf32>
    %142 = arith.addf %139, %141 : vector<10x128xf32>
    %cst_39 = arith.constant 0.000000e+00 : f32
    %143 = vector.broadcast %cst_39 : f32 to vector<10x128xf32>
    %144 = arith.maximumf %142, %143 : vector<10x128xf32>
    %c0_40 = arith.constant 0 : index
    %c0_41 = arith.constant 0 : index
    %145 = vector.load %arg6[%c0_40, %c0_41] : memref<1x10xf32, #tpu.memory_space<vmem>>, vector<1x10xf32>
    %cst_42 = arith.constant dense<0.000000e+00> : vector<1x128xf32>
    %146 = tpu.matmul %145, %144, %cst_42 {dimension_numbers = #tpu.dot_dimension_numbers<[1], [0], [0], [1], [0, 0, 1, 1], [], []>} : vector<1x10xf32>, vector<10x128xf32>, vector<1x128xf32> -> vector<1x128xf32>
    %147 = arith.addf %146, %137 : vector<1x128xf32>
    %c0_43 = arith.constant 0 : index
    %148 = memref.load %arg7[%c0_43] : memref<1xf32, #tpu.memory_space<smem>>
    %149 = vector.broadcast %148 : f32 to vector<1x128xf32>
    %150 = arith.addf %147, %149 : vector<1x128xf32>
    %c0_44 = arith.constant 0 : index
    %c0_45 = arith.constant 0 : index
    %c0_46 = arith.constant 0 : index
    %151 = vector.load %arg8[%c0_44, %c0_45, %c0_46] : memref<1x1x128xf32, #tpu.memory_space<vmem>>, vector<1x1x128xf32>
    %152 = vector.shape_cast %151 : vector<1x1x128xf32> to vector<1x128xf32>
    %153 = vector.shape_cast %150 : vector<1x128xf32> to vector<1x1x128xf32>
    tpu.vector_store %arg8[%c0_44, %c0_45, %c0_46], %153 {strides = array<i32>} : memref<1x1x128xf32, #tpu.memory_space<vmem>>, vector<1x1x128xf32>,
    return
  }
  func.func @transform_0(%arg0: i32) -> (i32, i32, i32) {
    %c0_i32 = arith.constant 0 : i32
    %c0_i32_0 = arith.constant 0 : i32
    %c0_i32_1 = arith.constant 0 : i32
    return %arg0, %c0_i32, %c0_i32_0 : i32, i32, i32
  }
  func.func @transform_1(%arg0: i32) -> (i32, i32, i32) {
    %c0_i32 = arith.constant 0 : i32
    %c0_i32_0 = arith.constant 0 : i32
    %c0_i32_1 = arith.constant 0 : i32
    %c0_i32_2 = arith.constant 0 : i32
    return %c0_i32, %c0_i32_0, %c0_i32_1 : i32, i32, i32
  }
  func.func @transform_2(%arg0: i32) -> (i32, i32) {
    %c0_i32 = arith.constant 0 : i32
    %c0_i32_0 = arith.constant 0 : i32
    %c0_i32_1 = arith.constant 0 : i32
    return %c0_i32, %c0_i32_0 : i32, i32
  }
  func.func @transform_3(%arg0: i32) -> (i32, i32) {
    %c0_i32 = arith.constant 0 : i32
    %c0_i32_0 = arith.constant 0 : i32
    %c0_i32_1 = arith.constant 0 : i32
    return %c0_i32, %c0_i32_0 : i32, i32
  }
  func.func @transform_4(%arg0: i32) -> (i32, i32) {
    %c0_i32 = arith.constant 0 : i32
    %c0_i32_0 = arith.constant 0 : i32
    %c0_i32_1 = arith.constant 0 : i32
    return %c0_i32, %c0_i32_0 : i32, i32
  }
  func.func @transform_5(%arg0: i32) -> (i32, i32) {
    %c0_i32 = arith.constant 0 : i32
    %c0_i32_0 = arith.constant 0 : i32
    %c0_i32_1 = arith.constant 0 : i32
    return %c0_i32, %c0_i32_0 : i32, i32
  }
  func.func @transform_6(%arg0: i32) -> i32 {
    %c0_i32 = arith.constant 0 : i32
    %c0_i32_0 = arith.constant 0 : i32
    return %c0_i32 : i32
  }
  func.func @transform_7(%arg0: i32) -> (i32, i32, i32) {
    %c0_i32 = arith.constant 0 : i32
    %c0_i32_0 = arith.constant 0 : i32
    %c0_i32_1 = arith.constant 0 : i32
    return %arg0, %c0_i32, %c0_i32_0 : i32, i32, i32
  }
}

</mosaic_0001>

<bundles_post_ra>
// kernel: tpu_custom_call.1
= control target key start
LH: loop header
LB: loop body
LE: loop exit
PB: predicated region body
PF: predicated region fallthrough
CT: control target
= control target key end

     0   :  { %13 = vsyncpa [#allocation4], 0  ;;  %s3245_s0 = inlined_call_operand.vmem [shape: s32[1,2,128], index: 0, kind: input, shape index: {}]   ;;  %s3246_s1 = inlined_call_operand.hbm [shape: f32[7,21,128], index: 1, kind: input, shape index: {}]   ;;  %s3247_s2 = inlined_call_operand.vmem [shape: f32[20,1], index: 2, kind: input, shape index: {}]   ;;  %s3248_s3 = inlined_call_operand.vmem [shape: f32[10,20], index: 3, kind: input, shape index: {}]   ;;  %s3249_s4 = inlined_call_operand.vmem [shape: f32[10,1], index: 4, kind: input, shape index: {}]   ;;  %s3250_s5 = inlined_call_operand.vmem [shape: f32[1,10], index: 5, kind: input, shape index: {}]   ;;  %s3251_s6 = inlined_call_operand.<no memory space> [shape: f32[1], index: 6, kind: input, shape index: {}]   ;;  %s3252_s7 = inlined_call_operand.hbm [shape: f32[1,1,128], index: 7, kind: output, shape index: {}]  }
   0x1   :  { %14 = vsyncpa [#allocation5], 0  ;;  %s2478_s24 = smov [#allocation3]   ;;  %s2430_s28 = scalar_lea.hbm %s3246_s1, 2688 }
   0x2   :  { %s22_s25 = sshll.u32 %s2478_s24, 4  ;;  %p2431_p0 = scmp.ne.s32.totalorder %s3246_s1, %s2430_s28  ;;  %s23_s25 = int_to_ptr.vmem [resolvable:$true] %s22_s25 }
   0x3   :  { %p2434_p1 = scmp.lt.u32.totalorder %s2430_s28, %s3246_s1 }
   0x5   :  { %p2436_p2 = pnand %p2434_p1, %p2431_p0 }
   0x7   :  { %2439 = shalt.err (!%p2436_p2)
}
   0x8   :  { %s2440_s10 = scalar_lea.vmem %s23_s25, 2688  ;;  %p2445_p4 = scmp.lt.s32.totalorder %s23_s25, %s23_s25 }
   0x9   :  { %p2441_p3 = scmp.ne.s32.totalorder %s23_s25, %s2440_s10  ;;  %p2446_p5 = scmp.lt.s32.totalorder %s2440_s10, %s2440_s10 }
   0xb   :  { %p2447_p6 = por %p2446_p5, %p2445_p4 }
   0xd   :  { %p2448_p7 = pnand %p2447_p6, %p2441_p3 }
   0xf   :  { %2451 = shalt.err (!%p2448_p7)
}
  0x10   :  { %s2479_s11 = smov 128   ;;  %s2480_s12 = smov 8  }
  0x11   :  { %28 = dma.hbm_to_vmem [thread:$0]  %s3246_s1, 2688, %s23_s25, [#allocation4], %s2479_s11, %s2479_s11, %s2480_s12  }
  0x12   :  { %2474 = dma.done.wait [#allocation4], 2688  }
  0x13   :  { %2475 = vsyncadd [#allocation4], 4294964608  ;;  %v44_v0 = vlaneseq  ;;  %v2481_v1 = vmov 0.0|0.0   ;;  %vm3253_vm0 = vmmov 0   ;;  %v2483_v3 = vmov 0.0   ;;  %v249_v55 = vld [vmem:[#allocation3 + $0x18] sm:$0xff] }
  0x14   :  { %2229 = vmatprep.subr.bf16.mxu1 %v2481_v1  ;;  %2301 = vmatprep.subr.bf16.mxu0 %v2481_v1  ;;  %v2564_v11 = vld [vmem:[%s3245_s0] ss:$0 sm:$0xff]  ;;  %v2569_v12 = vld [vmem:[%s3245_s0 + $0x1] ss:$0 sm:$0xff]  ;;  %v2484_v18 = vmov 1.0|1.0  }
  0x15   :  { %v2542_v2 = vshrl.u32 %v44_v0, 7  ;;  %2081 = vmatprep.mubr.msk.f32.mxu0 %vm3253_vm0, %v2483_v3  ;;  %1958 = vmatprep.mubr.msk.f32.mxu1 %vm3253_vm0, %v2483_v3  ;;  %v692_v57 = vld [vmem:[#allocation3 + $0x48] sm:$0xff]  ;;  %v250_v59 = vld [vmem:[#allocation3 + $0x20] sm:$0xff]  ;;  %v693_v61 = vld [vmem:[#allocation3 + $0x50] sm:$0xff]  ;;  %s2487_s13 = smov [#allocation6]  }
  0x16   :  { %v251_v62 = vld [vmem:[#allocation3 + $0x28] sm:$0x1f]  ;;  %v694_v0 = vld [vmem:[#allocation3 + $0x58] sm:$0x1f]  ;;  %s1545_s14 = sshll.u32 %s2487_s13, 4  ;;  %s1546_s14 = int_to_ptr.vmem [resolvable:$true] %s1545_s14 }
  0x17   :  { %v2549_v4 = vadd.s32 8, %v2542_v2  ;;  %v152_v5 = vadd.s32 128, %v2542_v2  ;;  %v2553_v6 = vadd.s32 16, %v2542_v2  ;;  %v595_v7 = vadd.s32 384, %v2542_v2  ;;  %s2452_s1 = scalar_lea.vmem %s1546_s14, 16  ;;  %s2456_s15 = scalar_lea.vmem %s1546_s14, 32 }
  0x18   :  { %v2557_v8 = vadd.s32 24, %v2542_v2  ;;  %v2582_v15 = vadd.s32 32, %v2542_v2  ;;  %v2586_v17 = vadd.s32 40, %v2542_v2  ;;  %v2604_v22 = vadd.s32 48, %v2542_v2  ;;  %p2453_p8 = scmp.ne.s32.totalorder %s1546_s14, %s2452_s1  ;;  %p2457_p9 = scmp.lt.s32.totalorder %s1546_s14, %s1546_s14 }
  0x19   :  { %v153_v9 = vadd.s32 128, %v2549_v4  ;;  %v596_v10 = vadd.s32 384, %v2549_v4  ;;  %v154_v13 = vadd.s32 128, %v2553_v6  ;;  %vm168_vm1 = vcmp.eq.s32.totalorder %v152_v5, %v2564_v11  ;;  %p2458_p10 = scmp.lt.s32.totalorder %s2456_s15, %s2452_s1 }
  0x1a   :  { %vm184_vm3 = vcmp.eq.s32.totalorder %v152_v5, %v2569_v12  ;;  %vm611_vm6 = vcmp.eq.s32.totalorder %v595_v7, %v2564_v11  ;;  %vm627_vm7 = vcmp.eq.s32.totalorder %v595_v7, %v2569_v12  ;;  %v155_v14 = vadd.s32 128, %v2557_v8 }
  0x1b   :  { %vm169_vm2 = vcmp.eq.s32.totalorder %v153_v9, %v2564_v11  ;;  %vm185_vm4 = vcmp.eq.s32.totalorder %v153_v9, %v2569_v12  ;;  %vm200_vm5 = vmor %vm168_vm1, %vm184_vm3  ;;  %vm612_vm9 = vcmp.eq.s32.totalorder %v596_v10, %v2564_v11  ;;  %vm628_vm10 = vcmp.eq.s32.totalorder %v596_v10, %v2569_v12  ;;  %p2459_p11 = por %p2458_p10, %p2457_p9 }
  0x1c   :  { %vm201_vm8 = vmor %vm169_vm2, %vm185_vm4  ;;  %v597_v16 = vadd.s32 384, %v2553_v6  ;;  %vm170_vm13 = vcmp.eq.s32.totalorder %v154_v13, %v2564_v11  ;;  %vm186_vm14 = vcmp.eq.s32.totalorder %v154_v13, %v2569_v12  ;;  %v598_v19 = vadd.s32 384, %v2557_v8 }
  0x1d   :  { %vm2230_vm11 = vmpackc.low %vm201_vm8, %vm200_vm5  ;;  %vm171_vm1 = vcmp.eq.s32.totalorder %v155_v14, %v2564_v11  ;;  %vm187_vm2 = vcmp.eq.s32.totalorder %v155_v14, %v2569_v12  ;;  %v156_v20 = vadd.s32 128, %v2582_v15  ;;  %v157_v21 = vadd.s32 128, %v2586_v17  ;;  %p2460_p12 = pnand %p2459_p11, %p2453_p8 }
  0x1e   :  { %2231 = vmatpush3.bf16.msk.msra.mxu1 %vm2230_vm11, %v2484_v18  ;;  %vm643_vm12 = vmor %vm611_vm6, %vm627_vm7  ;;  %vm613_vm5 = vcmp.eq.s32.totalorder %v597_v16, %v2564_v11  ;;  %vm629_vm6 = vcmp.eq.s32.totalorder %v597_v16, %v2569_v12  ;;  %vm614_vm8 = vcmp.eq.s32.totalorder %v598_v19, %v2564_v11  ;;  %v599_v23 = vadd.s32 384, %v2582_v15 }
  0x1f   :  { %vm644_vm15 = vmor %vm612_vm9, %vm628_vm10  ;;  %2232 = vmatprep.subr.bf16.mxu1 %v2481_v1  ;;  %vm630_vm9 = vcmp.eq.s32.totalorder %v598_v19, %v2569_v12  ;;  %v2608_v24 = vadd.s32 56, %v2542_v2  ;;  %v600_v25 = vadd.s32 384, %v2586_v17  ;;  %v158_v26 = vadd.s32 128, %v2604_v22  ;;  %v1327_v19 = vld [vmem:[%s3247_s2] sm:$0xff] }
  0x20   :  { %vm2302_vm3 = vmpackc.low %vm644_vm15, %vm643_vm12  ;;  %vm172_vm12 = vcmp.eq.s32.totalorder %v156_v20, %v2564_v11  ;;  %vm173_vm15 = vcmp.eq.s32.totalorder %v157_v21, %v2564_v11  ;;  %v2626_v28 = vadd.s32 64, %v2542_v2  ;;  %v601_v29 = vadd.s32 384, %v2604_v22 }
  0x21   :  { %2303 = vmatpush3.bf16.msk.msra.mxu0 %vm2302_vm3, %v2484_v18  ;;  %vm202_vm4 = vmor %vm170_vm13, %vm186_vm14  ;;  %vm188_vm13 = vcmp.eq.s32.totalorder %v156_v20, %v2569_v12  ;;  %v159_v27 = vadd.s32 128, %v2608_v24  ;;  %v2630_v30 = vadd.s32 72, %v2542_v2  ;;  %v602_v31 = vadd.s32 384, %v2608_v24 }
  0x22   :  { %2304 = vmatprep.subr.bf16.mxu0 %v2481_v1  ;;  %vm203_vm7 = vmor %vm171_vm1, %vm187_vm2  ;;  %vm189_vm1 = vcmp.eq.s32.totalorder %v157_v21, %v2569_v12  ;;  %v160_v32 = vadd.s32 128, %v2626_v28  ;;  %v2648_v34 = vadd.s32 80, %v2542_v2  ;;  %v603_v35 = vadd.s32 384, %v2626_v28  ;;  %v1329_v21 = vld [vmem:[%s3247_s2 + $0x10] sm:$0xf] }
  0x23   :  { %vm2233_vm10 = vmpackc.low %vm203_vm7, %vm202_vm4  ;;  %vm615_vm4 = vcmp.eq.s32.totalorder %v599_v23, %v2564_v11  ;;  %vm616_vm7 = vcmp.eq.s32.totalorder %v600_v25, %v2564_v11  ;;  %v161_v33 = vadd.s32 128, %v2630_v30  ;;  %v2652_v36 = vadd.s32 88, %v2542_v2 }
  0x24   :  { %2234 = vmatpush3.bf16.msk.msra.mxu1 %vm2233_vm10, %v2484_v18  ;;  %vm645_vm11 = vmor %vm613_vm5, %vm629_vm6  ;;  %vm631_vm5 = vcmp.eq.s32.totalorder %v599_v23, %v2569_v12  ;;  %v604_v37 = vadd.s32 384, %v2630_v30  ;;  %v162_v38 = vadd.s32 128, %v2648_v34  ;;  %v2670_v40 = vadd.s32 96, %v2542_v2 }
  0x25   :  { %vm646_vm14 = vmor %vm614_vm8, %vm630_vm9  ;;  %2235 = vmatprep.subr.bf16.mxu1 %v2481_v1  ;;  %vm632_vm8 = vcmp.eq.s32.totalorder %v600_v25, %v2569_v12  ;;  %v163_v39 = vadd.s32 128, %v2652_v36  ;;  %v605_v41 = vadd.s32 384, %v2648_v34  ;;  %v2674_v42 = vadd.s32 104, %v2542_v2 }
  0x26   :  { %vm2305_vm2 = vmpackc.low %vm646_vm14, %vm645_vm11  ;;  %vm174_vm11 = vcmp.eq.s32.totalorder %v158_v26, %v2564_v11  ;;  %vm175_vm14 = vcmp.eq.s32.totalorder %v159_v27, %v2564_v11  ;;  %v606_v43 = vadd.s32 384, %v2652_v36  ;;  %v164_v44 = vadd.s32 128, %v2670_v40 }
  0x27   :  { %2306 = vmatpush3.bf16.msk.msra.mxu0 %vm2305_vm2, %v2484_v18  ;;  %vm204_vm3 = vmor %vm172_vm12, %vm188_vm13  ;;  %vm190_vm12 = vcmp.eq.s32.totalorder %v158_v26, %v2569_v12  ;;  %v165_v45 = vadd.s32 128, %v2674_v42  ;;  %v2692_v46 = vadd.s32 112, %v2542_v2  ;;  %v607_v47 = vadd.s32 384, %v2670_v40  ;;  %v1328_v26 = vld [vmem:[%s3247_s2 + $0x8] sm:$0xff] }
  0x28   :  { %2307 = vmatprep.subr.bf16.mxu0 %v2481_v1  ;;  %vm205_vm6 = vmor %vm173_vm15, %vm189_vm1  ;;  %vm191_vm15 = vcmp.eq.s32.totalorder %v159_v27, %v2569_v12  ;;  %v2696_v48 = vadd.s32 120, %v2542_v2  ;;  %v608_v49 = vadd.s32 384, %v2674_v42  ;;  %v778_v54 = vadd.s32 512, %v2542_v2  ;;  %v1353_v27 = vld [vmem:[%s3249_s4] sm:$0xff] }
  0x29   :  { %vm2236_vm9 = vmpackc.low %vm205_vm6, %vm204_vm3  ;;  %vm617_vm3 = vcmp.eq.s32.totalorder %v601_v29, %v2564_v11  ;;  %vm618_vm6 = vcmp.eq.s32.totalorder %v602_v31, %v2564_v11  ;;  %v166_v50 = vadd.s32 128, %v2692_v46  ;;  %v609_v52 = vadd.s32 384, %v2692_v46 }
  0x2a   :  { %2237 = vmatpush3.bf16.msk.msra.mxu1 %vm2236_vm9, %v2484_v18  ;;  %vm647_vm10 = vmor %vm615_vm4, %vm631_vm5  ;;  %vm633_vm4 = vcmp.eq.s32.totalorder %v601_v29, %v2569_v12  ;;  %v167_v51 = vadd.s32 128, %v2696_v48  ;;  %v610_v53 = vadd.s32 384, %v2696_v48  ;;  %v779_v56 = vadd.s32 512, %v2549_v4  ;;  %v1354_v29 = vld [vmem:[%s3249_s4 + $0x8] sm:$0x3] }
  0x2b   :  { %vm648_vm13 = vmor %vm616_vm7, %vm632_vm8  ;;  %2238 = vmatprep.subr.bf16.mxu1 %v2481_v1  ;;  %vm634_vm7 = vcmp.eq.s32.totalorder %v602_v31, %v2569_v12  ;;  %v780_v58 = vadd.s32 512, %v2553_v6  ;;  %v781_v60 = vadd.s32 512, %v2557_v8  ;;  %v782_v63 = vadd.s32 512, %v2582_v15 }
  0x2c   :  { %vm2308_vm1 = vmpackc.low %vm648_vm13, %vm647_vm10  ;;  %vm176_vm10 = vcmp.eq.s32.totalorder %v160_v32, %v2564_v11  ;;  %vm177_vm13 = vcmp.eq.s32.totalorder %v161_v33, %v2564_v11  ;;  %v783_v5 = vadd.s32 512, %v2586_v17  ;;  %v784_v7 = vadd.s32 512, %v2604_v22 }
  0x2d   :  { %2309 = vmatpush3.bf16.msk.msra.mxu0 %vm2308_vm1, %v2484_v18  ;;  %vm206_vm2 = vmor %vm174_vm11, %vm190_vm12  ;;  %vm192_vm11 = vcmp.eq.s32.totalorder %v160_v32, %v2569_v12  ;;  %v785_v9 = vadd.s32 512, %v2608_v24  ;;  %v786_v10 = vadd.s32 512, %v2626_v28  ;;  %v787_v13 = vadd.s32 512, %v2630_v30 }
  0x2e   :  { %2310 = vmatprep.subr.bf16.mxu0 %v2481_v1  ;;  %vm207_vm5 = vmor %vm175_vm14, %vm191_vm15  ;;  %vm193_vm14 = vcmp.eq.s32.totalorder %v161_v33, %v2569_v12  ;;  %v788_v14 = vadd.s32 512, %v2648_v34  ;;  %v789_v16 = vadd.s32 512, %v2652_v36  ;;  %v2485_v20 = vmov 0  }
  0x2f   :  { %vm2239_vm8 = vmpackc.low %vm207_vm5, %vm206_vm2  ;;  %vm619_vm2 = vcmp.eq.s32.totalorder %v603_v35, %v2564_v11  ;;  %vm620_vm5 = vcmp.eq.s32.totalorder %v604_v37, %v2564_v11  ;;  %2426 = vset.pattern.permute.xlu0 %v2485_v20  ;;  %v790_v23 = vadd.s32 512, %v2670_v40  ;;  %2427 = vset.pattern.permute.xlu1 %v2485_v20  ;;  %v791_v25 = vadd.s32 512, %v2674_v42 }
  0x30   :  { %2240 = vmatpush3.bf16.msk.msra.mxu1 %vm2239_vm8, %v2484_v18  ;;  %vm649_vm9 = vmor %vm617_vm3, %vm633_vm4  ;;  %vm635_vm3 = vcmp.eq.s32.totalorder %v603_v35, %v2569_v12  ;;  %1332 = vperm.xlu0 %2426, %v1327_v19   ;;  %v792_v31 = vadd.s32 512, %v2692_v46  ;;  %v793_v32 = vadd.s32 512, %v2696_v48  ;;  %v412_v33 = vadd.s32 256, %v2542_v2  ;;  %v3021_v19 = vld [vmem:[%s3245_s0 + $0x1] ss:$0 sm:$0xff] }
  0x31   :  { %vm650_vm12 = vmor %vm618_vm6, %vm634_vm7  ;;  %2241 = vmatprep.subr.bf16.mxu1 %v2481_v1  ;;  %vm636_vm6 = vcmp.eq.s32.totalorder %v604_v37, %v2569_v12  ;;  %1342 = vperm.xlu1 %2427, %v1329_v21   ;;  %v413_v35 = vadd.s32 256, %v2549_v4  ;;  %v961_v37 = vadd.s32 640, %v2542_v2  ;;  %v974_v20 = vadd.s32 640, %v2674_v42 }
  0x32   :  { %vm2311_vm15 = vmpackc.low %vm650_vm12, %vm649_vm9  ;;  %vm178_vm9 = vcmp.eq.s32.totalorder %v162_v38, %v2564_v11  ;;  %vm179_vm12 = vcmp.eq.s32.totalorder %v163_v39, %v2564_v11  ;;  %v426_v21 = vadd.s32 256, %v2692_v46 }
  0x33   :  { %2312 = vmatpush3.bf16.msk.msra.mxu0 %vm2311_vm15, %v2484_v18  ;;  %vm208_vm1 = vmor %vm176_vm10, %vm192_vm11  ;;  %vm194_vm10 = vcmp.eq.s32.totalorder %v162_v38, %v2569_v12  ;;  %v149_v38 = vld [vmem:[#allocation3] sm:$0xff] }
  0x34   :  { %2313 = vmatprep.subr.bf16.mxu0 %v2481_v1  ;;  %vm209_vm4 = vmor %vm177_vm13, %vm193_vm14  ;;  %vm195_vm13 = vcmp.eq.s32.totalorder %v163_v39, %v2569_v12  ;;  %1337 = vperm.xlu0 %2426, %v1328_v26   ;;  %v962_v39 = vadd.s32 640, %v2549_v4  ;;  %v976_v26 = vadd.s32 640, %v2696_v48 }
  0x35   :  { %vm2242_vm7 = vmpackc.low %vm209_vm4, %vm208_vm1  ;;  %vm621_vm1 = vcmp.eq.s32.totalorder %v605_v41, %v2564_v11  ;;  %vm622_vm4 = vcmp.eq.s32.totalorder %v606_v43, %v2564_v11  ;;  %1357 = vperm.xlu1 %2427, %v1353_v27   ;;  %v1144_v27 = vadd.s32 768, %v2542_v2 }
  0x36   :  { %2243 = vmatpush3.bf16.msk.msra.mxu1 %vm2242_vm7, %v2484_v18  ;;  %vm651_vm8 = vmor %vm619_vm2, %vm635_vm3  ;;  %vm637_vm2 = vcmp.eq.s32.totalorder %v605_v41, %v2569_v12  ;;  %v414_v41 = vadd.s32 256, %v2553_v6 }
  0x37   :  { %vm652_vm11 = vmor %vm620_vm5, %vm636_vm6  ;;  %2244 = vmatprep.subr.bf16.mxu1 %v2481_v1  ;;  %vm638_vm5 = vcmp.eq.s32.totalorder %v606_v43, %v2569_v12  ;;  %v875_v43 = vld [vmem:[#allocation3 + $0x60] sm:$0xff] }
  0x38   :  { %vm2314_vm14 = vmpackc.low %vm652_vm11, %vm651_vm8  ;;  %vm180_vm8 = vcmp.eq.s32.totalorder %v164_v44, %v2564_v11  ;;  %vm181_vm11 = vcmp.eq.s32.totalorder %v165_v45, %v2564_v11  ;;  %1362 = vperm.xlu0 %2426, %v1354_v29   ;;  %v1145_v29 = vadd.s32 768, %v2549_v4 }
  0x39   :  { %2315 = vmatpush3.bf16.msk.msra.mxu0 %vm2314_vm14, %v2484_v18  ;;  %vm210_vm15 = vmor %vm178_vm9, %vm194_vm10  ;;  %vm196_vm9 = vcmp.eq.s32.totalorder %v164_v44, %v2569_v12  ;;  %v415_v44 = vadd.s32 256, %v2557_v8 }
  0x3a   :  { %2316 = vmatprep.subr.bf16.mxu0 %v2481_v1  ;;  %vm211_vm3 = vmor %vm179_vm12, %vm195_vm13  ;;  %vm197_vm12 = vcmp.eq.s32.totalorder %v165_v45, %v2569_v12  ;;  %v150_v45 = vld [vmem:[#allocation3 + $0x8] sm:$0xff] }
  0x3b   :  { %vm2245_vm6 = vmpackc.low %vm211_vm3, %vm210_vm15  ;;  %vm623_vm15 = vcmp.eq.s32.totalorder %v607_v47, %v2564_v11  ;;  %vm624_vm3 = vcmp.eq.s32.totalorder %v608_v49, %v2564_v11 }
  0x3c   :  { %2246 = vmatpush3.bf16.msk.msra.mxu1 %vm2245_vm6, %v2484_v18  ;;  %vm653_vm7 = vmor %vm621_vm1, %vm637_vm2  ;;  %vm639_vm1 = vcmp.eq.s32.totalorder %v607_v47, %v2569_v12  ;;  %v963_v47 = vadd.s32 640, %v2553_v6 }
  0x3d   :  { %vm654_vm10 = vmor %vm622_vm4, %vm638_vm5  ;;  %2247 = vmatprep.subr.bf16.mxu1 %v2481_v1  ;;  %vm640_vm4 = vcmp.eq.s32.totalorder %v608_v49, %v2569_v12 }
  0x3e   :  { %vm2317_vm13 = vmpackc.low %vm654_vm10, %vm653_vm7  ;;  %vm182_vm7 = vcmp.eq.s32.totalorder %v166_v50, %v2564_v11  ;;  %vm183_vm10 = vcmp.eq.s32.totalorder %v167_v51, %v2564_v11 }
  0x3f   :  { %2318 = vmatpush3.bf16.msk.msra.mxu0 %vm2317_vm13, %v2484_v18  ;;  %vm212_vm14 = vmor %vm180_vm8, %vm196_vm9  ;;  %vm198_vm8 = vcmp.eq.s32.totalorder %v166_v50, %v2569_v12  ;;  %v964_v50 = vadd.s32 640, %v2557_v8 }
  0x40   :  { %2319 = vmatprep.subr.bf16.mxu0 %v2481_v1  ;;  %vm213_vm2 = vmor %vm181_vm11, %vm197_vm12  ;;  %vm199_vm11 = vcmp.eq.s32.totalorder %v167_v51, %v2569_v12  ;;  %v876_v51 = vld [vmem:[#allocation3 + $0x68] sm:$0xff] }
  0x41   :  { %vm2248_vm5 = vmpackc.low %vm213_vm2, %vm212_vm14  ;;  %vm625_vm14 = vcmp.eq.s32.totalorder %v609_v52, %v2564_v11  ;;  %vm626_vm2 = vcmp.eq.s32.totalorder %v610_v53, %v2564_v11 }
  0x42   :  { %2249 = vmatpush3.bf16.msk.msra.mxu1 %vm2248_vm5, %v2484_v18  ;;  %vm655_vm6 = vmor %vm623_vm15, %vm639_vm1  ;;  %vm641_vm15 = vcmp.eq.s32.totalorder %v609_v52, %v2569_v12  ;;  %v416_v52 = vadd.s32 256, %v2582_v15 }
  0x43   :  { %vm656_vm9 = vmor %vm624_vm3, %vm640_vm4  ;;  %2250 = vmatprep.subr.bf16.mxu1 %v2481_v1  ;;  %vm642_vm3 = vcmp.eq.s32.totalorder %v610_v53, %v2569_v12  ;;  %v151_v53 = vld [vmem:[#allocation3 + $0x10] sm:$0x1f] }
  0x44   :  { %vm2320_vm12 = vmpackc.low %vm656_vm9, %vm655_vm6  ;;  %vm65_vm6 = vcmp.eq.s32.totalorder %v2542_v2, %v2564_v11  ;;  %vm66_vm9 = vcmp.eq.s32.totalorder %v2549_v4, %v2564_v11 }
  0x45   :  { %2321 = vmatpush3.bf16.msk.msra.mxu0 %vm2320_vm12, %v2484_v18  ;;  %vm214_vm13 = vmor %vm182_vm7, %vm198_vm8  ;;  %vm85_vm7 = vcmp.eq.s32.totalorder %v2542_v2, %v2569_v12  ;;  %v509_v2 = vld [vmem:[#allocation3 + $0x30] sm:$0xff] }
  0x46   :  { %2322 = vmatprep.subr.bf16.mxu0 %v2481_v1  ;;  %vm215_vm1 = vmor %vm183_vm10, %vm199_vm11  ;;  %vm86_vm10 = vcmp.eq.s32.totalorder %v2549_v4, %v2569_v12  ;;  %v1147_v4 = vadd.s32 768, %v2557_v8 }
  0x47   :  { %vm2251_vm4 = vmpackc.low %vm215_vm1, %vm214_vm13  ;;  %vm794_vm13 = vcmp.eq.s32.totalorder %v778_v54, %v2564_v11  ;;  %vm795_vm1 = vcmp.eq.s32.totalorder %v779_v56, %v2564_v11 }
  0x48   :  { %2252 = vmatpush3.bf16.msk.msra.mxu1 %vm2251_vm4, %v2484_v18  ;;  %vm657_vm5 = vmor %vm625_vm14, %vm641_vm15  ;;  %vm810_vm14 = vcmp.eq.s32.totalorder %v778_v54, %v2569_v12  ;;  %v417_v54 = vadd.s32 256, %v2586_v17 }
  0x49   :  { %vm658_vm8 = vmor %vm626_vm2, %vm642_vm3  ;;  %2253 = vmatprep.subr.bf16.mxu1 %v2481_v1  ;;  %vm811_vm2 = vcmp.eq.s32.totalorder %v779_v56, %v2569_v12  ;;  %v877_v56 = vld [vmem:[#allocation3 + $0x70] sm:$0x1f] }
  0x4a   :  { %vm2323_vm11 = vmpackc.low %vm658_vm8, %vm657_vm5  ;;  %vm67_vm5 = vcmp.eq.s32.totalorder %v2553_v6, %v2564_v11  ;;  %vm68_vm8 = vcmp.eq.s32.totalorder %v2557_v8, %v2564_v11 }
  0x4b   :  { %2324 = vmatpush3.bf16.msk.msra.mxu0 %vm2323_vm11, %v2484_v18  ;;  %1959 = vmatmul.mubr.f32.vlgmr.msra.gmra.mrb[0].mxu1 %v249_v55  ;;  %vm101_vm12 = vmor %vm65_vm6, %vm85_vm7  ;;  %vm87_vm6 = vcmp.eq.s32.totalorder %v2553_v6, %v2569_v12  ;;  %v965_v55 = vadd.s32 640, %v2582_v15 }
  0x4c   :  { %2325 = vmatprep.subr.bf16.mxu0 %v2481_v1  ;;  %vm102_vm15 = vmor %vm66_vm9, %vm86_vm10  ;;  %1961 = vmatprep.mubr.msk.f32.mxu1 %vm3253_vm0, %v2483_v3  ;;  %vm88_vm9 = vcmp.eq.s32.totalorder %v2557_v8, %v2569_v12  ;;  %v1149_v8 = vadd.s32 768, %v2586_v17 }
  0x4d   :  { %vm2254_vm3 = vmpackc.low %vm102_vm15, %vm101_vm12  ;;  %vm796_vm12 = vcmp.eq.s32.totalorder %v780_v58, %v2564_v11  ;;  %vm797_vm15 = vcmp.eq.s32.totalorder %v781_v60, %v2564_v11 }
  0x4e   :  { %2082 = vmatmul.mubr.f32.vlgmr.msra.gmra.mrb[0].mxu0 %v692_v57  ;;  %2255 = vmatpush3.bf16.msk.msra.mxu1 %vm2254_vm3, %v2484_v18  ;;  %vm826_vm4 = vmor %vm794_vm13, %vm810_vm14  ;;  %vm812_vm13 = vcmp.eq.s32.totalorder %v780_v58, %v2569_v12  ;;  %v966_v57 = vadd.s32 640, %v2586_v17  ;;  %v418_v58 = vadd.s32 256, %v2604_v22 }
  0x4f   :  { %vm827_vm7 = vmor %vm795_vm1, %vm811_vm2  ;;  %2256 = vmatprep.subr.bf16.mxu1 %v2481_v1  ;;  %2084 = vmatprep.mubr.msk.f32.mxu0 %vm3253_vm0, %v2483_v3  ;;  %vm813_vm1 = vcmp.eq.s32.totalorder %v781_v60, %v2569_v12  ;;  %v967_v60 = vadd.s32 640, %v2604_v22 }
  0x50   :  { %vm2326_vm10 = vmpackc.low %vm827_vm7, %vm826_vm4  ;;  %1962 = vmatmul.mubr.f32.gmra.mrb[2].mxu1 %v250_v59  ;;  %vm69_vm4 = vcmp.eq.s32.totalorder %v2582_v15, %v2564_v11  ;;  %vm70_vm7 = vcmp.eq.s32.totalorder %v2586_v17, %v2564_v11  ;;  %v419_v59 = vadd.s32 256, %v2608_v24 }
  0x51   :  { %2327 = vmatpush3.bf16.msk.msra.mxu0 %vm2326_vm10, %v2484_v18  ;;  %vm103_vm11 = vmor %vm67_vm5, %vm87_vm6  ;;  %1964 = vmatprep.mubr.msk.f32.mxu1 %vm3253_vm0, %v2483_v3  ;;  %vm89_vm5 = vcmp.eq.s32.totalorder %v2582_v15, %v2569_v12 }
  0x52   :  { %2328 = vmatprep.subr.bf16.mxu0 %v2481_v1  ;;  %vm104_vm14 = vmor %vm68_vm8, %vm88_vm9  ;;  %2085 = vmatmul.mubr.f32.gmra.mrb[2].mxu0 %v693_v61  ;;  %vm90_vm8 = vcmp.eq.s32.totalorder %v2586_v17, %v2569_v12  ;;  %v968_v61 = vadd.s32 640, %v2608_v24  ;;  %v1151_v17 = vadd.s32 768, %v2608_v24 }
  0x53   :  { %vm2257_vm2 = vmpackc.low %vm104_vm14, %vm103_vm11  ;;  %2087 = vmatprep.mubr.msk.f32.mxu0 %vm3253_vm0, %v2483_v3  ;;  %vm798_vm11 = vcmp.eq.s32.totalorder %v782_v63, %v2564_v11  ;;  %vm799_vm14 = vcmp.eq.s32.totalorder %v783_v5, %v2564_v11 }
  0x54   :  { %2258 = vmatpush3.bf16.msk.msra.mxu1 %vm2257_vm2, %v2484_v18  ;;  %vm828_vm3 = vmor %vm796_vm12, %vm812_vm13  ;;  %vm814_vm12 = vcmp.eq.s32.totalorder %v782_v63, %v2569_v12  ;;  %v421_v63 = vadd.s32 256, %v2630_v30 }
  0x55   :  { %vm829_vm6 = vmor %vm797_vm15, %vm813_vm1  ;;  %2259 = vmatprep.subr.bf16.mxu1 %v2481_v1  ;;  %1965 = vmatmul.mubr.f32.gmra.mrb[4].mxu1 %v251_v62  ;;  %vm815_vm15 = vcmp.eq.s32.totalorder %v783_v5, %v2569_v12  ;;  %v420_v62 = vadd.s32 256, %v2626_v28  ;;  %v970_v5 = vadd.s32 640, %v2630_v30 }
  0x56   :  { %vm2329_vm9 = vmpackc.low %vm829_vm6, %vm828_vm3  ;;  %2088 = vmatmul.mubr.f32.gmra.mrb[4].mxu0 %v694_v0  ;;  %1999 = vmatprep.mubr.msk.f32.mxu1 %vm3253_vm0, %v2483_v3  ;;  %vm71_vm3 = vcmp.eq.s32.totalorder %v2604_v22, %v2564_v11  ;;  %vm72_vm6 = vcmp.eq.s32.totalorder %v2608_v24, %v2564_v11  ;;  %v969_v0 = vadd.s32 640, %v2626_v28 }
  0x57   :  { %2330 = vmatpush3.bf16.msk.msra.mxu0 %vm2329_vm9, %v2484_v18  ;;  %vm105_vm10 = vmor %vm69_vm4, %vm89_vm5  ;;  %2122 = vmatprep.mubr.msk.f32.mxu0 %vm3253_vm0, %v2483_v3  ;;  %vm91_vm4 = vcmp.eq.s32.totalorder %v2604_v22, %v2569_v12 }
  0x58   :  { %2331 = vmatprep.subr.bf16.mxu0 %v2481_v1  ;;  %vm106_vm13 = vmor %vm70_vm7, %vm90_vm8  ;;  %vm92_vm7 = vcmp.eq.s32.totalorder %v2608_v24, %v2569_v12  ;;  %v511_v24 = vld [vmem:[#allocation3 + $0x40] sm:$0x1f] }
  0x59   :  { %vm2260_vm1 = vmpackc.low %vm106_vm13, %vm105_vm10  ;;  %vm800_vm10 = vcmp.eq.s32.totalorder %v784_v7, %v2564_v11  ;;  %vm801_vm13 = vcmp.eq.s32.totalorder %v785_v9, %v2564_v11 }
  0x5a   :  { %2261 = vmatpush3.bf16.msk.msra.mxu1 %vm2260_vm1, %v2484_v18  ;;  %vm830_vm2 = vmor %vm798_vm11, %vm814_vm12  ;;  %vm816_vm11 = vcmp.eq.s32.totalorder %v784_v7, %v2569_v12  ;;  %v422_v7 = vadd.s32 256, %v2648_v34 }
  0x5b   :  { %vm831_vm5 = vmor %vm799_vm14, %vm815_vm15  ;;  %2262 = vmatprep.subr.bf16.mxu1 %v2481_v1  ;;  %vm817_vm14 = vcmp.eq.s32.totalorder %v785_v9, %v2569_v12  ;;  %v423_v9 = vadd.s32 256, %v2652_v36 }
  0x5c   :  { %vm2332_vm8 = vmpackc.low %vm831_vm5, %vm830_vm2  ;;  %vm73_vm2 = vcmp.eq.s32.totalorder %v2626_v28, %v2564_v11  ;;  %vm74_vm5 = vcmp.eq.s32.totalorder %v2630_v30, %v2564_v11 }
  0x5d   :  { %2333 = vmatpush3.bf16.msk.msra.mxu0 %vm2332_vm8, %v2484_v18  ;;  %vm107_vm9 = vmor %vm71_vm3, %vm91_vm4  ;;  %vm93_vm3 = vcmp.eq.s32.totalorder %v2626_v28, %v2569_v12 }
  0x5e   :  { %2334 = vmatprep.subr.bf16.mxu0 %v2481_v1  ;;  %vm108_vm12 = vmor %vm72_vm6, %vm92_vm7  ;;  %vm94_vm6 = vcmp.eq.s32.totalorder %v2630_v30, %v2569_v12 }
  0x5f   :  { %vm2263_vm15 = vmpackc.low %vm108_vm12, %vm107_vm9  ;;  %vm802_vm9 = vcmp.eq.s32.totalorder %v786_v10, %v2564_v11  ;;  %vm803_vm12 = vcmp.eq.s32.totalorder %v787_v13, %v2564_v11 }
  0x60   :  { %2264 = vmatpush3.bf16.msk.msra.mxu1 %vm2263_vm15, %v2484_v18  ;;  %vm832_vm1 = vmor %vm800_vm10, %vm816_vm11  ;;  %vm818_vm10 = vcmp.eq.s32.totalorder %v786_v10, %v2569_v12  ;;  %v971_v10 = vadd.s32 640, %v2648_v34 }
  0x61   :  { %vm833_vm4 = vmor %vm801_vm13, %vm817_vm14  ;;  %2265 = vmatprep.subr.bf16.mxu1 %v2481_v1  ;;  %vm819_vm13 = vcmp.eq.s32.totalorder %v787_v13, %v2569_v12  ;;  %v972_v13 = vadd.s32 640, %v2652_v36 }
  0x62   :  { %vm2335_vm7 = vmpackc.low %vm833_vm4, %vm832_vm1  ;;  %vm75_vm1 = vcmp.eq.s32.totalorder %v2648_v34, %v2564_v11  ;;  %vm76_vm4 = vcmp.eq.s32.totalorder %v2652_v36, %v2564_v11 }
  0x63   :  { %2336 = vmatpush3.bf16.msk.msra.mxu0 %vm2335_vm7, %v2484_v18  ;;  %vm109_vm8 = vmor %vm73_vm2, %vm93_vm3  ;;  %vm95_vm2 = vcmp.eq.s32.totalorder %v2648_v34, %v2569_v12 }
  0x64   :  { %2337 = vmatprep.subr.bf16.mxu0 %v2481_v1  ;;  %vm110_vm11 = vmor %vm74_vm5, %vm94_vm6  ;;  %vm96_vm5 = vcmp.eq.s32.totalorder %v2652_v36, %v2569_v12 }
  0x65   :  { %vm2266_vm14 = vmpackc.low %vm110_vm11, %vm109_vm8  ;;  %vm804_vm8 = vcmp.eq.s32.totalorder %v788_v14, %v2564_v11  ;;  %vm805_vm11 = vcmp.eq.s32.totalorder %v789_v16, %v2564_v11 }
  0x66   :  { %2267 = vmatpush3.bf16.msk.msra.mxu1 %vm2266_vm14, %v2484_v18  ;;  %vm834_vm15 = vmor %vm802_vm9, %vm818_vm10  ;;  %vm820_vm9 = vcmp.eq.s32.totalorder %v788_v14, %v2569_v12  ;;  %v424_v14 = vadd.s32 256, %v2670_v40 }
  0x67   :  { %vm835_vm3 = vmor %vm803_vm12, %vm819_vm13  ;;  %2268 = vmatprep.subr.bf16.mxu1 %v2481_v1  ;;  %vm821_vm12 = vcmp.eq.s32.totalorder %v789_v16, %v2569_v12  ;;  %v3015_v16 = vld [vmem:[%s3245_s0] ss:$0 sm:$0xff] }
  0x68   :  { %vm2338_vm6 = vmpackc.low %vm835_vm3, %vm834_vm15  ;;  %vm77_vm15 = vcmp.eq.s32.totalorder %v2670_v40, %v2564_v11  ;;  %vm78_vm3 = vcmp.eq.s32.totalorder %v2674_v42, %v2564_v11 }
  0x69   :  { %2339 = vmatpush3.bf16.msk.msra.mxu0 %vm2338_vm6, %v2484_v18  ;;  %vm111_vm7 = vmor %vm75_vm1, %vm95_vm2  ;;  %vm97_vm1 = vcmp.eq.s32.totalorder %v2670_v40, %v2569_v12 }
  0x6a   :  { %2340 = vmatprep.subr.bf16.mxu0 %v2481_v1  ;;  %vm112_vm10 = vmor %vm76_vm4, %vm96_vm5  ;;  %vm98_vm4 = vcmp.eq.s32.totalorder %v2674_v42, %v2569_v12 }
  0x6b   :  { %vm2269_vm13 = vmpackc.low %vm112_vm10, %vm111_vm7  ;;  %vm806_vm7 = vcmp.eq.s32.totalorder %v790_v23, %v2564_v11  ;;  %vm807_vm10 = vcmp.eq.s32.totalorder %v791_v25, %v2564_v11 }
  0x6c   :  { %2270 = vmatpush3.bf16.msk.msra.mxu1 %vm2269_vm13, %v2484_v18  ;;  %vm836_vm14 = vmor %vm804_vm8, %vm820_vm9  ;;  %vm822_vm8 = vcmp.eq.s32.totalorder %v790_v23, %v2569_v12  ;;  %v427_v23 = vadd.s32 256, %v2696_v48 }
  0x6d   :  { %vm837_vm2 = vmor %vm805_vm11, %vm821_vm12  ;;  %2271 = vmatprep.subr.bf16.mxu1 %v2481_v1  ;;  %vm823_vm11 = vcmp.eq.s32.totalorder %v791_v25, %v2569_v12  ;;  %v975_v25 = vadd.s32 640, %v2692_v46 }
  0x6e   :  { %vm2341_vm5 = vmpackc.low %vm837_vm2, %vm836_vm14  ;;  %vm79_vm14 = vcmp.eq.s32.totalorder %v2692_v46, %v2564_v11  ;;  %vm80_vm2 = vcmp.eq.s32.totalorder %v2696_v48, %v2564_v11 }
  0x6f   :  { %2342 = vmatpush3.bf16.msk.msra.mxu0 %vm2341_vm5, %v2484_v18  ;;  %vm113_vm6 = vmor %vm77_vm15, %vm97_vm1  ;;  %vm99_vm15 = vcmp.eq.s32.totalorder %v2692_v46, %v2569_v12 }
  0x70   :  { %2343 = vmatprep.subr.bf16.mxu0 %v2481_v1  ;;  %vm114_vm9 = vmor %vm78_vm3, %vm98_vm4  ;;  %vm100_vm3 = vcmp.eq.s32.totalorder %v2696_v48, %v2569_v12 }
  0x71   :  { %vm2272_vm12 = vmpackc.low %vm114_vm9, %vm113_vm6  ;;  %vm808_vm6 = vcmp.eq.s32.totalorder %v792_v31, %v2564_v11  ;;  %vm809_vm9 = vcmp.eq.s32.totalorder %v793_v32, %v2564_v11 }
  0x72   :  { %2273 = vmatpush3.bf16.msk.msra.mxu1 %vm2272_vm12, %v2484_v18  ;;  %vm838_vm13 = vmor %vm806_vm7, %vm822_vm8  ;;  %vm824_vm7 = vcmp.eq.s32.totalorder %v792_v31, %v2569_v12  ;;  %v1146_v31 = vadd.s32 768, %v2553_v6  ;;  %v1058_v6 = vld [vmem:[#allocation3 + $0x78] sm:$0xff] }
  0x73   :  { %vm839_vm1 = vmor %vm807_vm10, %vm823_vm11  ;;  %2274 = vmatprep.subr.bf16.mxu1 %v2481_v1  ;;  %vm825_vm10 = vcmp.eq.s32.totalorder %v793_v32, %v2569_v12  ;;  %v1148_v32 = vadd.s32 768, %v2582_v15  ;;  %v510_v15 = vld [vmem:[#allocation3 + $0x38] sm:$0xff] }
  0x74   :  { %vm2344_vm4 = vmpackc.low %vm839_vm1, %vm838_vm13  ;;  %vm428_vm13 = vcmp.eq.s32.totalorder %v412_v33, %v2564_v11  ;;  %vm429_vm1 = vcmp.eq.s32.totalorder %v413_v35, %v2564_v11 }
  0x75   :  { %2345 = vmatpush3.bf16.msk.msra.mxu0 %vm2344_vm4, %v2484_v18  ;;  %vm115_vm5 = vmor %vm79_vm14, %vm99_vm15  ;;  %vm444_vm14 = vcmp.eq.s32.totalorder %v412_v33, %v2569_v12 }
  0x76   :  { %2346 = vmatprep.subr.bf16.mxu0 %v2481_v1  ;;  %vm116_vm8 = vmor %vm80_vm2, %vm100_vm3  ;;  %vm445_vm2 = vcmp.eq.s32.totalorder %v413_v35, %v2569_v12  ;;  %v1150_v35 = vadd.s32 768, %v2604_v22  ;;  %v1059_v22 = vld [vmem:[#allocation3 + $0x80] sm:$0xff] }
  0x77   :  { %vm2275_vm11 = vmpackc.low %vm116_vm8, %vm115_vm5  ;;  %vm977_vm5 = vcmp.eq.s32.totalorder %v961_v37, %v2564_v11  ;;  %vm978_vm8 = vcmp.eq.s32.totalorder %v962_v39, %v2564_v11 }
  0x78   :  { %2276 = vmatpush3.bf16.msk.msra.mxu1 %vm2275_vm11, %v2484_v18  ;;  %vm840_vm12 = vmor %vm808_vm6, %vm824_vm7  ;;  %vm993_vm6 = vcmp.eq.s32.totalorder %v961_v37, %v2569_v12 }
  0x79   :  { %vm841_vm15 = vmor %vm809_vm9, %vm825_vm10  ;;  %2277 = vmatprep.subr.bf16.mxu1 %v2481_v1  ;;  %vm994_vm9 = vcmp.eq.s32.totalorder %v962_v39, %v2569_v12  ;;  %v1152_v39 = vadd.s32 768, %v2626_v28  ;;  %v1154_v28 = vadd.s32 768, %v2648_v34  ;;  %v1156_v34 = vadd.s32 768, %v2670_v40 }
  0x7a   :  { %vm2347_vm3 = vmpackc.low %vm841_vm15, %vm840_vm12  ;;  %vm430_vm12 = vcmp.eq.s32.totalorder %v414_v41, %v2564_v11  ;;  %vm431_vm15 = vcmp.eq.s32.totalorder %v415_v44, %v2564_v11 }
  0x7b   :  { %2348 = vmatpush3.bf16.msk.msra.mxu0 %vm2347_vm3, %v2484_v18  ;;  %2000 = vmatmul.mubr.f32.vlgmr.msra.gmra.mrb[6].mxu1 %v149_v38  ;;  %vm460_vm4 = vmor %vm428_vm13, %vm444_vm14  ;;  %vm446_vm13 = vcmp.eq.s32.totalorder %v414_v41, %v2569_v12 }
  0x7c   :  { %2349 = vmatprep.subr.bf16.mxu0 %v2481_v1  ;;  %vm461_vm7 = vmor %vm429_vm1, %vm445_vm2  ;;  %2002 = vmatprep.mubr.msk.f32.mxu1 %vm3253_vm0, %v2483_v3  ;;  %vm447_vm1 = vcmp.eq.s32.totalorder %v415_v44, %v2569_v12 }
  0x7d   :  { %vm2278_vm10 = vmpackc.low %vm461_vm7, %vm460_vm4  ;;  %vm979_vm4 = vcmp.eq.s32.totalorder %v963_v47, %v2564_v11  ;;  %vm980_vm7 = vcmp.eq.s32.totalorder %v964_v50, %v2564_v11 }
  0x7e   :  { %2123 = vmatmul.mubr.f32.vlgmr.msra.gmra.mrb[6].mxu0 %v875_v43  ;;  %2279 = vmatpush3.bf16.msk.msra.mxu1 %vm2278_vm10, %v2484_v18  ;;  %vm2920_vm11 = vmor %vm977_vm5, %vm993_vm6  ;;  %vm995_vm5 = vcmp.eq.s32.totalorder %v963_v47, %v2569_v12  ;;  %v1153_v43 = vadd.s32 768, %v2630_v30  ;;  %v1060_v30 = vld [vmem:[#allocation3 + $0x88] sm:$0x1f]  ;;  %v1155_v47 = vadd.s32 768, %v2652_v36 }
  0x7f   :  { %vm1010_vm14 = vmor %vm978_vm8, %vm994_vm9  ;;  %2280 = vmatprep.subr.bf16.mxu1 %v2481_v1  ;;  %2003 = vmatmul.mubr.f32.gmra.mrb[8].mxu1 %v150_v45  ;;  %vm996_vm8 = vcmp.eq.s32.totalorder %v964_v50, %v2569_v12  ;;  %v1157_v50 = vadd.s32 768, %v2674_v42 }
  0x80   :  { %vm2350_vm2 = vmpackc.low %vm1010_vm14, %vm2920_vm11  ;;  %2125 = vmatprep.mubr.msk.f32.mxu0 %vm3253_vm0, %v2483_v3  ;;  %2005 = vmatprep.mubr.msk.f32.mxu1 %vm3253_vm0, %v2483_v3  ;;  %vm432_vm11 = vcmp.eq.s32.totalorder %v416_v52, %v2564_v11  ;;  %vm433_vm14 = vcmp.eq.s32.totalorder %v417_v54, %v2564_v11 }
  0x81   :  { %2351 = vmatpush3.bf16.msk.msra.mxu0 %vm2350_vm2, %v2484_v18  ;;  %vm462_vm3 = vmor %vm430_vm12, %vm446_vm13  ;;  %vm448_vm12 = vcmp.eq.s32.totalorder %v416_v52, %v2569_v12  ;;  %v1159_v52 = vadd.s32 768, %v2696_v48  ;;  %v1242_v48 = vld [vmem:[#allocation3 + $0x98] sm:$0xff] }
  0x82   :  { %2352 = vmatprep.subr.bf16.mxu0 %v2481_v1  ;;  %vm463_vm6 = vmor %vm431_vm15, %vm447_vm1  ;;  %2126 = vmatmul.mubr.f32.gmra.mrb[8].mxu0 %v876_v51  ;;  %vm449_vm15 = vcmp.eq.s32.totalorder %v417_v54, %v2569_v12  ;;  %v1243_v54 = vld [vmem:[#allocation3 + $0xa0] sm:$0x1f]  ;;  %v1352_v51 = vld [vmem:[%s3248_s3 + $0x8] sm:$0x3] }
  0x83   :  { %vm2281_vm9 = vmpackc.low %vm463_vm6, %vm462_vm3  ;;  %2128 = vmatprep.mubr.msk.f32.mxu0 %vm3253_vm0, %v2483_v3  ;;  %2006 = vmatmul.mubr.f32.gmra.mrb[4].mxu1 %v151_v53  ;;  %vm981_vm3 = vcmp.eq.s32.totalorder %v965_v55, %v2564_v11  ;;  %vm982_vm6 = vcmp.eq.s32.totalorder %v966_v57, %v2564_v11 }
  0x84   :  { %2282 = vmatpush3.bf16.msk.msra.mxu1 %vm2281_vm9, %v2484_v18  ;;  %vm1011_vm10 = vmor %vm979_vm4, %vm995_vm5  ;;  %2040 = vmatprep.mubr.msk.f32.mxu1 %vm3253_vm0, %v2483_v3  ;;  %vm997_vm4 = vcmp.eq.s32.totalorder %v965_v55, %v2569_v12 }
  0x85   :  { %vm1012_vm13 = vmor %vm980_vm7, %vm996_vm8  ;;  %2283 = vmatprep.subr.bf16.mxu1 %v2481_v1  ;;  %vm998_vm7 = vcmp.eq.s32.totalorder %v966_v57, %v2569_v12 }
  0x86   :  { %vm2353_vm1 = vmpackc.low %vm1012_vm13, %vm1011_vm10  ;;  %2129 = vmatmul.mubr.f32.gmra.mrb[4].mxu0 %v877_v56  ;;  %vm434_vm10 = vcmp.eq.s32.totalorder %v418_v58, %v2564_v11  ;;  %vm435_vm13 = vcmp.eq.s32.totalorder %v419_v59, %v2564_v11 }
  0x87   :  { %2354 = vmatpush3.bf16.msk.msra.mxu0 %vm2353_vm1, %v2484_v18  ;;  %vm464_vm2 = vmor %vm432_vm11, %vm448_vm12  ;;  %2163 = vmatprep.mubr.msk.f32.mxu0 %vm3253_vm0, %v2483_v3  ;;  %vm450_vm11 = vcmp.eq.s32.totalorder %v418_v58, %v2569_v12 }
  0x88   :  { %2355 = vmatprep.subr.bf16.mxu0 %v2481_v1  ;;  %vm465_vm5 = vmor %vm433_vm14, %vm449_vm15  ;;  %vm451_vm14 = vcmp.eq.s32.totalorder %v419_v59, %v2569_v12 }
  0x89   :  { %vm2284_vm8 = vmpackc.low %vm465_vm5, %vm464_vm2  ;;  %vm983_vm2 = vcmp.eq.s32.totalorder %v967_v60, %v2564_v11  ;;  %vm984_vm5 = vcmp.eq.s32.totalorder %v968_v61, %v2564_v11 }
  0x8a   :  { %2285 = vmatpush3.bf16.msk.msra.mxu1 %vm2284_vm8, %v2484_v18  ;;  %vm1013_vm9 = vmor %vm981_vm3, %vm997_vm4  ;;  %vm999_vm3 = vcmp.eq.s32.totalorder %v967_v60, %v2569_v12 }
  0x8b   :  { %vm1014_vm12 = vmor %vm982_vm6, %vm998_vm7  ;;  %2286 = vmatprep.subr.bf16.mxu1 %v2481_v1  ;;  %vm1000_vm6 = vcmp.eq.s32.totalorder %v968_v61, %v2569_v12 }
  0x8c   :  { %vm2356_vm15 = vmpackc.low %vm1014_vm12, %vm1013_vm9  ;;  %vm436_vm9 = vcmp.eq.s32.totalorder %v420_v62, %v2564_v11  ;;  %vm437_vm12 = vcmp.eq.s32.totalorder %v421_v63, %v2564_v11 }
  0x8d   :  { %2357 = vmatpush3.bf16.msk.msra.mxu0 %vm2356_vm15, %v2484_v18  ;;  %vm466_vm1 = vmor %vm434_vm10, %vm450_vm11  ;;  %vm452_vm10 = vcmp.eq.s32.totalorder %v420_v62, %v2569_v12  ;;  %v1351_v62 = vld [vmem:[%s3248_s3] sm:$0xff] }
  0x8e   :  { %2358 = vmatprep.subr.bf16.mxu0 %v2481_v1  ;;  %vm467_vm4 = vmor %vm435_vm13, %vm451_vm14  ;;  %vm453_vm13 = vcmp.eq.s32.totalorder %v421_v63, %v2569_v12 }
  0x8f   :  { %vm2287_vm7 = vmpackc.low %vm467_vm4, %vm466_vm1  ;;  %vm985_vm1 = vcmp.eq.s32.totalorder %v969_v0, %v2564_v11  ;;  %vm986_vm4 = vcmp.eq.s32.totalorder %v970_v5, %v2564_v11 }
  0x90   :  { %2288 = vmatpush3.bf16.msk.msra.mxu1 %vm2287_vm7, %v2484_v18  ;;  %vm1015_vm8 = vmor %vm983_vm2, %vm999_vm3  ;;  %vm1001_vm2 = vcmp.eq.s32.totalorder %v969_v0, %v2569_v12 }
  0x91   :  { %vm1016_vm11 = vmor %vm984_vm5, %vm1000_vm6  ;;  %2289 = vmatprep.subr.bf16.mxu1 %v2481_v1  ;;  %vm1002_vm5 = vcmp.eq.s32.totalorder %v970_v5, %v2569_v12 }
  0x92   :  { %vm2359_vm14 = vmpackc.low %vm1016_vm11, %vm1015_vm8  ;;  %vm438_vm8 = vcmp.eq.s32.totalorder %v422_v7, %v2564_v11  ;;  %vm439_vm11 = vcmp.eq.s32.totalorder %v423_v9, %v2564_v11  ;;  %v425_v11 = vadd.s32 256, %v2674_v42  ;;  %v1158_v42 = vadd.s32 768, %v2692_v46  ;;  %v1241_v46 = vld [vmem:[#allocation3 + $0x90] sm:$0xff] }
  0x93   :  { %2360 = vmatpush3.bf16.msk.msra.mxu0 %vm2359_vm14, %v2484_v18  ;;  %vm468_vm15 = vmor %vm436_vm9, %vm452_vm10  ;;  %vm454_vm9 = vcmp.eq.s32.totalorder %v422_v7, %v2569_v12 }
  0x94   :  { %2361 = vmatprep.subr.bf16.mxu0 %v2481_v1  ;;  %vm469_vm3 = vmor %vm437_vm12, %vm453_vm13  ;;  %vm455_vm12 = vcmp.eq.s32.totalorder %v423_v9, %v2569_v12  ;;  %v973_v12 = vadd.s32 640, %v2670_v40 }
  0x95   :  { %vm2290_vm6 = vmpackc.low %vm469_vm3, %vm468_vm15  ;;  %vm987_vm15 = vcmp.eq.s32.totalorder %v971_v10, %v3015_v16  ;;  %vm988_vm3 = vcmp.eq.s32.totalorder %v972_v13, %v3015_v16 }
  0x96   :  { %2291 = vmatpush3.bf16.msk.msra.mxu1 %vm2290_vm6, %v2484_v18  ;;  %vm1017_vm7 = vmor %vm985_vm1, %vm1001_vm2  ;;  %vm1003_vm1 = vcmp.eq.s32.totalorder %v971_v10, %v3021_v19 }
  0x97   :  { %vm1018_vm10 = vmor %vm986_vm4, %vm1002_vm5  ;;  %2292 = vmatprep.subr.bf16.mxu1 %v2481_v1  ;;  %vm1004_vm4 = vcmp.eq.s32.totalorder %v972_v13, %v3021_v19 }
  0x98   :  { %vm2362_vm13 = vmpackc.low %vm1018_vm10, %vm1017_vm7  ;;  %vm440_vm7 = vcmp.eq.s32.totalorder %v424_v14, %v3015_v16  ;;  %vm441_vm10 = vcmp.eq.s32.totalorder %v425_v11, %v3015_v16 }
  0x99   :  { %2363 = vmatpush3.bf16.msk.msra.mxu0 %vm2362_vm13, %v2484_v18  ;;  %vm470_vm14 = vmor %vm438_vm8, %vm454_vm9  ;;  %vm456_vm8 = vcmp.eq.s32.totalorder %v424_v14, %v3021_v19 }
  0x9a   :  { %2364 = vmatprep.subr.bf16.mxu0 %v2481_v1  ;;  %vm471_vm2 = vmor %vm439_vm11, %vm455_vm12  ;;  %vm457_vm11 = vcmp.eq.s32.totalorder %v425_v11, %v3021_v19 }
  0x9b   :  { %vm2293_vm5 = vmpackc.low %vm471_vm2, %vm470_vm14  ;;  %vm989_vm14 = vcmp.eq.s32.totalorder %v973_v12, %v3015_v16  ;;  %vm990_vm2 = vcmp.eq.s32.totalorder %v974_v20, %v3015_v16 }
  0x9c   :  { %2294 = vmatpush3.bf16.msk.msra.mxu1 %vm2293_vm5, %v2484_v18  ;;  %vm1019_vm6 = vmor %vm987_vm15, %vm1003_vm1  ;;  %vm1005_vm15 = vcmp.eq.s32.totalorder %v973_v12, %v3021_v19 }
  0x9d   :  { %vm1020_vm9 = vmor %vm988_vm3, %vm1004_vm4  ;;  %2295 = vmatprep.subr.bf16.mxu1 %v2481_v1  ;;  %vm1006_vm3 = vcmp.eq.s32.totalorder %v974_v20, %v3021_v19 }
  0x9e   :  { %vm2365_vm12 = vmpackc.low %vm1020_vm9, %vm1019_vm6  ;;  %vm442_vm6 = vcmp.eq.s32.totalorder %v426_v21, %v3015_v16  ;;  %vm443_vm9 = vcmp.eq.s32.totalorder %v427_v23, %v3015_v16 }
  0x9f   :  { %2366 = vmatpush3.bf16.msk.msra.mxu0 %vm2365_vm12, %v2484_v18  ;;  %vm472_vm13 = vmor %vm440_vm7, %vm456_vm8  ;;  %vm458_vm7 = vcmp.eq.s32.totalorder %v426_v21, %v3021_v19 }
  0xa0   :  { %2367 = vmatprep.subr.bf16.mxu0 %v2481_v1  ;;  %vm473_vm1 = vmor %vm441_vm10, %vm457_vm11  ;;  %vm459_vm10 = vcmp.eq.s32.totalorder %v427_v23, %v3021_v19 }
  0xa1   :  { %vm2296_vm4 = vmpackc.low %vm473_vm1, %vm472_vm13  ;;  %vm991_vm13 = vcmp.eq.s32.totalorder %v975_v25, %v3015_v16  ;;  %vm992_vm1 = vcmp.eq.s32.totalorder %v976_v26, %v3015_v16 }
  0xa2   :  { %2297 = vmatpush3.bf16.msk.msra.mxu1 %vm2296_vm4, %v2484_v18  ;;  %vm1021_vm5 = vmor %vm989_vm14, %vm1005_vm15  ;;  %vm1007_vm14 = vcmp.eq.s32.totalorder %v975_v25, %v3021_v19 }
  0xa3   :  { %vm1022_vm8 = vmor %vm990_vm2, %vm1006_vm3  ;;  %2298 = vmatprep.subr.bf16.mxu1 %v2481_v1  ;;  %vm1008_vm2 = vcmp.eq.s32.totalorder %v976_v26, %v3021_v19 }
  0xa4   :  { %vm2368_vm11 = vmpackc.low %vm1022_vm8, %vm1021_vm5  ;;  %vm1160_vm5 = vcmp.eq.s32.totalorder %v1144_v27, %v3015_v16  ;;  %vm1161_vm8 = vcmp.eq.s32.totalorder %v1145_v29, %v3015_v16 }
  0xa5   :  { %2369 = vmatpush3.bf16.msk.msra.mxu0 %vm2368_vm11, %v2484_v18  ;;  %vm474_vm12 = vmor %vm442_vm6, %vm458_vm7  ;;  %vm1176_vm6 = vcmp.eq.s32.totalorder %v1144_v27, %v3021_v19 }
  0xa6   :  { %2370 = vmatprep.subr.bf16.mxu0 %v2481_v1  ;;  %vm475_vm15 = vmor %vm443_vm9, %vm459_vm10  ;;  %vm1177_vm9 = vcmp.eq.s32.totalorder %v1145_v29, %v3021_v19 }
  0xa7   :  { %vm2299_vm3 = vmpackc.low %vm475_vm15, %vm474_vm12  ;;  %vm1162_vm12 = vcmp.eq.s32.totalorder %v1146_v31, %v3015_v16  ;;  %vm1163_vm15 = vcmp.eq.s32.totalorder %v1147_v4, %v3015_v16 }
  0xa8   :  { %2300 = vmatpush3.bf16.msk.msra.mxu1 %vm2299_vm3, %v2484_v18  ;;  %vm1023_vm4 = vmor %vm991_vm13, %vm1007_vm14  ;;  %vm1178_vm13 = vcmp.eq.s32.totalorder %v1146_v31, %v3021_v19 }
  0xa9   :  { %vm1024_vm7 = vmor %vm992_vm1, %vm1008_vm2  ;;  %vm1179_vm1 = vcmp.eq.s32.totalorder %v1147_v4, %v3021_v19 }
  0xaa   :  { %vm2371_vm10 = vmpackc.low %vm1024_vm7, %vm1023_vm4  ;;  %vm1164_vm4 = vcmp.eq.s32.totalorder %v1148_v32, %v3015_v16  ;;  %vm1165_vm7 = vcmp.eq.s32.totalorder %v1149_v8, %v3015_v16 }
  0xab   :  { %2372 = vmatpush3.bf16.msk.msra.mxu0 %vm2371_vm10, %v2484_v18  ;;  %2041 = vmatmul.mubr.f32.vlgmr.msra.gmra.mrb[10].mxu1 %v509_v2  ;;  %vm3069_vm11 = vmor %vm1160_vm5, %vm1176_vm6  ;;  %vm1180_vm5 = vcmp.eq.s32.totalorder %v1148_v32, %v3021_v19 }
  0xac   :  { %2373 = vmatprep.subr.bf16.mxu0 %v2481_v1  ;;  %vm1193_vm14 = vmor %vm1161_vm8, %vm1177_vm9  ;;  %2043 = vmatprep.mubr.msk.f32.mxu1 %vm3253_vm0, %v2483_v3  ;;  %vm1181_vm8 = vcmp.eq.s32.totalorder %v1149_v8, %v3021_v19 }
  0xad   :  { %vm2374_vm2 = vmpackc.low %vm1193_vm14, %vm3069_vm11  ;;  %vm1166_vm11 = vcmp.eq.s32.totalorder %v1150_v35, %v3015_v16  ;;  %vm1167_vm14 = vcmp.eq.s32.totalorder %v1151_v17, %v3015_v16 }
  0xae   :  { %2164 = vmatmul.mubr.f32.vlgmr.msra.gmra.mrb[10].mxu0 %v1058_v6  ;;  %vm3084_vm3 = vmor %vm1162_vm12, %vm1178_vm13  ;;  %vm1182_vm12 = vcmp.eq.s32.totalorder %v1150_v35, %v3021_v19 }
  0xaf   :  { %2375 = vmatpush3.bf16.msk.msra.mxu0 %vm2374_vm2, %v2484_v18  ;;  %2044 = vmatmul.mubr.f32.gmra.mrb[12].mxu1 %v510_v15  ;;  %vm3092_vm6 = vmor %vm1163_vm15, %vm1179_vm1  ;;  %vm1183_vm15 = vcmp.eq.s32.totalorder %v1151_v17, %v3021_v19  ;;  %v1333_v37 = vpop.permute.xlu0 %1332 }
  0xb0   :  { %2376 = vmatprep.subr.bf16.mxu0 %v2481_v1  ;;  %vm2377_vm9 = vmpackc.low %vm3092_vm6, %vm3084_vm3  ;;  %2046 = vmatprep.mubr.msk.f32.mxu1 %vm3253_vm0, %v2483_v3  ;;  %vm1168_vm3 = vcmp.eq.s32.totalorder %v1152_v39, %v3015_v16  ;;  %vm1169_vm6 = vcmp.eq.s32.totalorder %v1153_v43, %v3015_v16  ;;  %v1343_v36 = vpop.permute.xlu1 %1342 }
  0xb1   :  { %2166 = vmatprep.mubr.msk.f32.mxu0 %vm3253_vm0, %v2483_v3  ;;  %vm3110_vm10 = vmor %vm1164_vm4, %vm1180_vm5  ;;  %vm1184_vm4 = vcmp.eq.s32.totalorder %v1152_v39, %v3021_v19 }
  0xb2   :  { %vm3117_vm13 = vmor %vm1165_vm7, %vm1181_vm8  ;;  %2167 = vmatmul.mubr.f32.gmra.mrb[12].mxu0 %v1059_v22  ;;  %vm1185_vm7 = vcmp.eq.s32.totalorder %v1153_v43, %v3021_v19 }
  0xb3   :  { %2378 = vmatpush3.bf16.msk.msra.mxu0 %vm2377_vm9, %v2484_v18  ;;  %2047 = vmatmul.mubr.f32.gmra.mrb[4].mxu1 %v511_v24  ;;  %vm2380_vm1 = vmpackc.low %vm3117_vm13, %vm3110_vm10  ;;  %vm1170_vm10 = vcmp.eq.s32.totalorder %v1154_v28, %v3015_v16  ;;  %vm1171_vm13 = vcmp.eq.s32.totalorder %v1155_v47, %v3015_v16  ;;  %v1338_v44 = vpop.permute.xlu0 %1337 }
  0xb4   :  { %2379 = vmatprep.subr.bf16.mxu0 %v2481_v1  ;;  %vm3130_vm2 = vmor %vm1166_vm11, %vm1182_vm12  ;;  %2169 = vmatprep.mubr.msk.f32.mxu0 %vm3253_vm0, %v2483_v3  ;;  %vm1186_vm11 = vcmp.eq.s32.totalorder %v1154_v28, %v3021_v19 }
  0xb5   :  { %vm3139_vm5 = vmor %vm1167_vm14, %vm1183_vm15  ;;  %vm1187_vm14 = vcmp.eq.s32.totalorder %v1155_v47, %v3021_v19  ;;  %vm1174_vm15 = vcmp.eq.s32.totalorder %v1158_v42, %v3015_v16 }
  0xb6   :  { %vm2383_vm8 = vmpackc.low %vm3139_vm5, %vm3130_vm2  ;;  %2170 = vmatmul.mubr.f32.gmra.mrb[4].mxu0 %v1060_v30  ;;  %vm1190_vm2 = vcmp.eq.s32.totalorder %v1158_v42, %v3021_v19 }
  0xb7   :  { %2381 = vmatpush3.bf16.msk.msra.mxu0 %vm2380_vm1, %v2484_v18  ;;  %vm3151_vm9 = vmor %vm1168_vm3, %vm1184_vm4  ;;  %2204 = vmatprep.mubr.msk.f32.mxu0 %vm3253_vm0, %v2483_v3  ;;  %vm1172_vm3 = vcmp.eq.s32.totalorder %v1156_v34, %v3015_v16  ;;  %vm1188_vm4 = vcmp.eq.s32.totalorder %v1156_v34, %v3021_v19 }
  0xb8   :  { %2382 = vmatprep.subr.bf16.mxu0 %v2481_v1  ;;  %vm3161_vm12 = vmor %vm1169_vm6, %vm1185_vm7  ;;  %vm1173_vm7 = vcmp.eq.s32.totalorder %v1157_v50, %v3015_v16 }
  0xb9   :  { %vm3172_vm1 = vmor %vm1170_vm10, %vm1186_vm11  ;;  %vm1189_vm10 = vcmp.eq.s32.totalorder %v1157_v50, %v3021_v19 }
  0xba   :  { %vm3185_vm6 = vmor %vm1171_vm13, %vm1187_vm14  ;;  %vm1191_vm13 = vcmp.eq.s32.totalorder %v1159_v52, %v3021_v19 }
  0xbb   :  { %2384 = vmatpush3.bf16.msk.msra.mxu0 %vm2383_vm8, %v2484_v18  ;;  %vm2389_vm11 = vmpackc.low %vm3185_vm6, %vm3172_vm1  ;;  %vm1175_vm8 = vcmp.eq.s32.totalorder %v1159_v52, %v3015_v16  ;;  %v1363_v52 = vpop.permute.xlu0 %1362 }
  0xbc   :  { %2385 = vmatprep.subr.bf16.mxu0 %v2481_v1  ;;  %vm1204_vm0 = vmor %vm1172_vm3, %vm1188_vm4 }
  0xbd   :  { %vm1205_vm5 = vmor %vm1173_vm7, %vm1189_vm10  ;;  %vm2486_vm7 = vmmov 1  }
  0xbe   :  { %vm3279_vm14 = vmpackc.low %vm3161_vm12, %vm3151_vm9  ;;  %vm3280_vm9 = vmmov 0   ;;  %vm1372_vm12 = vcmask 1043456  }
  0xbf   :  { %2387 = vmatpush3.bf16.msk.msra.mxu0 %vm3279_vm14, %v2484_v18  ;;  %vm2392_vm1 = vmpackc.low %vm1205_vm5, %vm1204_vm0  ;;  %vm1365_vm0 = vcmask 162816  }
  0xc0   :  { %2388 = vmatprep.subr.bf16.mxu0 %v2481_v1  ;;  %vm1206_vm3 = vmor %vm1174_vm15, %vm1190_vm2  ;;  %2219 = vmatprep.mubr.msk.f32.mxu1 %vm1365_vm0, %v1351_v62  ;;  %vm1461_vm15 = vcmask 1041408  }
  0xc1   :  { %vm1207_vm4 = vmor %vm1175_vm8, %vm1191_vm13 }
  0xc2   :  { %vm2395_vm6 = vmpackc.low %vm1207_vm4, %vm1206_vm3 }
  0xc3   :  { %2390 = vmatpush3.bf16.msk.msra.mxu0 %vm2389_vm11, %v2484_v18  ;;  %vm2403_vm10 = vmpackc.low %vm1461_vm15, %vm2486_vm7  ;;  %vm1457_vm11 = vcmask 80896  }
  0xc4   :  { %2391 = vmatprep.subr.bf16.mxu0 %v2481_v1 }
  0xc7   :  { %2393 = vmatpush3.bf16.msk.msra.mxu0 %vm2392_vm1, %v2484_v18 }
  0xc8   :  { %2394 = vmatprep.subr.bf16.mxu0 %v2481_v1 }
  0xcb   :  { %2396 = vmatpush3.bf16.msk.msra.mxu0 %vm2395_vm6, %v2484_v18 }
  0xce   :  { %2205 = vmatmul.mubr.f32.vlgmr.msra.gmra.mrb[14].mxu0 %v1241_v46  ;;  %v1358_v46 = vpop.permute.xlu1 %1357 }
  0xcf   :  { %2207 = vmatprep.mubr.msk.f32.mxu0 %vm3280_vm9, %v2483_v3 }
  0xd2   :  { %2208 = vmatmul.mubr.f32.gmra.mrb[16].mxu0 %v1242_v48 }
  0xd3   :  { %2210 = vmatprep.mubr.msk.f32.mxu0 %vm3280_vm9, %v2483_v3 }
  0xd6   :  { %2211 = vmatmul.mubr.f32.gmra.mrb[4].mxu0 %v1243_v54 }
 0x11e   :  { %v318_v55 = vpop.f32.mrb[0].mxu1 }
 0x11f   :  { %v1960_v56 = vpop.f32.mrb[1].mxu1 }
 0x121   :  { %v761_v57 = vpop.f32.mrb[0].mxu0 }
 0x122   :  { %v2083_v58 = vpop.f32.mrb[1].mxu0 }
 0x123   :  { %v323_v59 = vpop.f32.mrb[2].mxu1 }
 0x124   :  { %v1963_v60 = vpop.f32.mrb[3].mxu1 }
 0x125   :  { %v766_v61 = vpop.f32.mrb[2].mxu0  ;;  %v1536_v60 = vstv %s3251_s6 }
 0x126   :  { %v2086_v18 = vpop.f32.mrb[3].mxu0 }
 0x14e   :  { %v398_v63 = vpop.f32.mrb[6].mxu1 }
 0x14f   :  { %v399_v0 = vadd.f32 %v398_v63, %v318_v55  ;;  %v2001_v5 = vpop.f32.mrb[7].mxu1 }
 0x151   :  { %v944_v7 = vpop.f32.mrb[6].mxu0 }
 0x152   :  { %v2124_v9 = vpop.f32.mrb[7].mxu0  ;;  %v403_v10 = vpop.f32.mrb[8].mxu1 }
 0x153   :  { %v404_v13 = vadd.f32 %v403_v10, %v323_v59  ;;  %v2004_v14 = vpop.f32.mrb[9].mxu1 }
 0x155   :  { %v949_v16 = vpop.f32.mrb[8].mxu0 }
 0x156   :  { %v2127_v19 = vpop.f32.mrb[9].mxu0 }
 0x17e   :  { %v578_v11 = vpop.f32.mrb[10].mxu1 }
 0x17f   :  { %v592_v12 = vadd.f32 %v578_v11, %v399_v0  ;;  %v2042_v20 = vpop.f32.mrb[11].mxu1 }
 0x181   :  { %v775_v21 = vadd.f32 %v761_v57, %v592_v12  ;;  %v1127_v23 = vpop.f32.mrb[10].mxu0 }
 0x182   :  { %v2165_v25 = vpop.f32.mrb[11].mxu0  ;;  %v583_v26 = vpop.f32.mrb[12].mxu1 }
 0x183   :  { %v958_v27 = vadd.f32 %v944_v7, %v775_v21  ;;  %v593_v29 = vadd.f32 %v583_v26, %v404_v13  ;;  %v2045_v31 = vpop.f32.mrb[13].mxu1 }
 0x185   :  { %v1141_v2 = vadd.f32 %v1127_v23, %v958_v27  ;;  %v776_v4 = vadd.f32 %v766_v61, %v593_v29  ;;  %v1132_v32 = vpop.f32.mrb[12].mxu0 }
 0x186   :  { %v588_v6 = vpop.f32.mrb[4].mxu1  ;;  %v2168_v33 = vpop.f32.mrb[13].mxu0 }
 0x187   :  { %v2048_v8 = vpop.f32.mrb[5].mxu1  ;;  %v959_v15 = vadd.f32 %v949_v16, %v776_v4 }
 0x189   :  { %v1142_v35 = vadd.f32 %v1132_v32, %v959_v15 }
 0x1a1   :  { %v1310_v17 = vpop.f32.mrb[14].mxu0 }
 0x1a2   :  { %v1324_v38 = vadd.f32 %v1310_v17, %v1141_v2  ;;  %v2206_v22 = vpop.f32.mrb[15].mxu0 }
 0x1a4   :  { %v1345_v39 = vadd.f32 %v1333_v37, %v1324_v38 }
 0x1a5   :  { %v1315_v24 = vpop.f32.mrb[16].mxu0 }
 0x1a6   :  { %v1325_v41 = vadd.f32 %v1315_v24, %v1142_v35  ;;  %v2209_v43 = vpop.f32.mrb[17].mxu0  ;;  %v1348_v45 = vmax.f32 %v1345_v39, 0.0 }
 0x1a8   :  { %v1346_v28 = vadd.f32 %v1338_v44, %v1325_v41 }
 0x1a9   :  { %v1320_v30 = vpop.f32.mrb[4].mxu0 }
 0x1aa   :  { %v1349_v47 = vmax.f32 %v1346_v28, 0.0  ;;  %v2405_v49 = vadd.f32 %v1320_v30, %v588_v6  ;;  %v2212_v34 = vpop.f32.mrb[5].mxu0 }
 0x1ac   :  { %v1347_v50 = vadd.f32 %v2405_v49, %v1343_v36  ;;  %v2397_v40 = vpack.c.bf16 %v1349_v47, %v1348_v45 }
 0x1ae   :  { %v1350_v42 = vmax.f32 %v1347_v50, 0.0  ;;  %2398 = vmatprep.subr.bf16.mxu1 %v2397_v40 }
 0x1af   :  { %2400 = vmatpush3.bf16.msra.mxu1 %v2397_v40 }
 0x1b0   :  { %2217 = vmatprep.subr.msk.mxu1 %vm1372_vm12, %v1350_v42 }
 0x1b3   :  { %2218 = vmatpush3.msk.msra.mxu1 %vm1372_vm12, %v1350_v42 }
 0x1b4   :  { %2220 = vmatmul.mubr.msk.f32.vlgmr.msra.gmra.mrb[14].mxu1 %vm1365_vm0, %v1352_v51  ;;  %2401 = vmatprep.subr.bf16.mxu1 %v2481_v1  ;;  %v1453_v1 = vld [vmem:[%s3250_s5] sm:$0x1] }
 0x1b5   :  { %2226 = vmatprep.mubr.msk.f32.mxu1 %vm3280_vm9, %v2483_v3  ;;  %v1455_v3 = vrot.slane %v2405_v49, 4 }
 0x287   :  { %v2221_v53 = vpop.f32.mrb[14].mxu1 }
 0x288   :  { %v1448_v48 = vadd.f32 %v2221_v53, %v1363_v52  ;;  %v1442_v54 = vpop.f32.mrb[15].mxu1 }
 0x289   :  { %v1443_v55 = vadd.f32 %v1442_v54, %v1358_v46 }
 0x28a   :  { %v1452_v56 = vmax.f32 %v1448_v48, 0.0 }
 0x28b   :  { %v1451_v57 = vmax.f32 %v1443_v55, 0.0 }
 0x28d   :  { %v2402_v58 = vpack.c.bf16 %v1452_v56, %v1451_v57 }
 0x28f   :  { %2404 = vmatpush3.bf16.msk.msra.mxu1 %vm2403_vm10, %v2402_v58 }
 0x292   :  { %2227 = vmatmul.mubr.msk.f32.vlgmr.msra.gmra.mrb[16].mxu1 %vm1457_vm11, %v1453_v1 }
 0x365   :  { %v1531_v59 = vpop.f32.mrb[16].mxu1 }
 0x366   :  { %v1532_v61 = vadd.f32 %v1531_v59, %v1455_v3  ;;  %v2228_v18 = vpop.f32.mrb[17].mxu1 }
 0x368   :  { %v1537_v62 = vadd.f32 %v1536_v60, %v1532_v61 }
 0x36a   :  { %1538 = vst [vmem:[#allocation6] sm:$0x1] %v1537_v62 }
 0x36b   :  { %2463 = shalt.err (!%p2460_p12)
}
 0x36c   :  { %s2464_s17 = scalar_lea.hbm %s3252_s7, 16 }
 0x36d   :  { %p2465_p13 = scmp.ne.s32.totalorder %s3252_s7, %s2464_s17  ;;  %p2468_p0 = scmp.lt.u32.totalorder %s2464_s17, %s3252_s7 }
 0x36f   :  { %p2470_p1 = pnand %p2468_p0, %p2465_p13 }
 0x371   :  { %2473 = shalt.err (!%p2470_p1)
}
 0x372   :  { %1548 = dma.vmem_to_hbm [thread:$0]  %s1546_s14, 16, %s3252_s7, [#allocation5]  }
 0x373   :  { %2476 = dma.done.wait [#allocation5], 16  }
 0x374   :  { %2477 = vsyncadd [#allocation5], 4294967280 }
 0x375   :  { %1552 = vsyncpa [#allocation4], 1 }
 0x376   :  { %1553 = vsyncpa [#allocation5], 1 }

</bundles_post_ra>
